<compile_context>
chip_gen: v7x
topology: tpu7x:2x2x1
jax: 0.10.0
libtpu: 0.0.40
codegen_flags: <defaults>
</compile_context>

<pallas_src>
import functools

import jax
import jax.numpy as jnp
from jax.experimental import pallas as pl
from jax.experimental.pallas import tpu as pltpu


def _cca_loss_kernel(z1_ref, z2_ref, out_ref,
                     s1_ref, q1_ref, s2_ref, q2_ref,
                     g1_ref, g2_ref, cross_ref,
                     *, n_total: int, lambda_param: float):
    p = pl.program_id(0)           # 0: column-stats sweep, 1: Gram sweep
    i = pl.program_id(1)           # N-tile index
    nb = pl.num_programs(1)

    @pl.when((p == 0) & (i == 0))
    def _init():
        s1_ref[...] = jnp.zeros_like(s1_ref)
        q1_ref[...] = jnp.zeros_like(q1_ref)
        s2_ref[...] = jnp.zeros_like(s2_ref)
        q2_ref[...] = jnp.zeros_like(q2_ref)
        g1_ref[...] = jnp.zeros_like(g1_ref)
        g2_ref[...] = jnp.zeros_like(g2_ref)
        cross_ref[...] = jnp.zeros_like(cross_ref)

    z1 = z1_ref[...].astype(jnp.float32)
    z2 = z2_ref[...].astype(jnp.float32)
    d_static = z1.shape[1]

    @pl.when(p == 0)
    def _pass0():
        # Per-column raw moments (cross-sublane reduces on the XLU).
        s1_ref[...] += jnp.sum(z1, axis=0, keepdims=True)
        q1_ref[...] += jnp.sum(z1 * z1, axis=0, keepdims=True)
        s2_ref[...] += jnp.sum(z2, axis=0, keepdims=True)
        q2_ref[...] += jnp.sum(z2 * z2, axis=0, keepdims=True)

    @pl.when(p == 1)
    def _pass1():
        n = jnp.float32(n_total)
        d = jnp.float32(d_static)
        # Column mean and unbiased variance from the pass-0 moments; fold the
        # 1/sqrt(D) Gram scaling into the per-column scale (rsqrt -> EUP slot).
        m1 = s1_ref[...] * (1.0 / n)
        m2 = s2_ref[...] * (1.0 / n)
        var1 = (q1_ref[...] - n * m1 * m1) * (1.0 / (n - 1.0))
        var2 = (q2_ref[...] - n * m2 * m2) * (1.0 / (n - 1.0))
        scale1 = jax.lax.rsqrt(var1 * d)          # 1 / (std1 * sqrt(D))
        scale2 = jax.lax.rsqrt(var2 * d)

        z1s = (z1 - m1) * scale1                  # (tn, D), row-broadcast only
        z2s = (z2 - m2) * scale2

        # Centered Gram accumulation, contracting over the N axis directly
        # (no explicit transpose before the MXU). c = sum over tiles.
        dn = (((0,), (0,)), ((), ()))
        g1_ref[...] += jax.lax.dot_general(z1s, z1s, dimension_numbers=dn,
                                           preferred_element_type=jnp.float32)
        g2_ref[...] += jax.lax.dot_general(z2s, z2s, dimension_numbers=dn,
                                           preferred_element_type=jnp.float32)
        # Per-column cross sum for the invariance term.
        cross_ref[...] += jnp.sum(z1s * z2s, axis=0, keepdims=True)

    @pl.when((p == 1) & (i == nb - 1))
    def _finalize():
        n = jnp.float32(n_total)
        d = jnp.float32(d_static)
        c1 = g1_ref[...]
        c2 = g2_ref[...]
        # ||I - c||^2 = sum(c*c) - 2*trace(c) + D, with trace(c) = N-1 exactly.
        loss_dec1 = jnp.sum(c1 * c1) - 2.0 * (n - 1.0) + d
        loss_dec2 = jnp.sum(c2 * c2) - 2.0 * (n - 1.0) + d
        # ||z1n - z2n||^2 / D = 2*(N-1) - 2*sum(z1n*z2n)/D  (1/D folded in scale).
        loss_inv = 2.0 * (n - 1.0) - 2.0 * jnp.sum(cross_ref[...])
        out_ref[0, 0] = loss_inv + jnp.float32(lambda_param) * (loss_dec1 + loss_dec2)


def cca_loss(z1: jax.Array, z2: jax.Array, lambda_param: float = 0.001,
             block_n: int | None = None) -> jax.Array:
    assert z1.shape == z2.shape and z1.ndim == 2
    N, D = z1.shape

    if block_n is None:
        block_n = N
        for cand in (256, 128, 64, 32, 16, 8):
            if N % cand == 0:
                block_n = cand
                break
    assert N % block_n == 0, "N must be divisible by block_n"
    nb = N // block_n

    kernel = functools.partial(_cca_loss_kernel, n_total=N,
                               lambda_param=lambda_param)

    grid_spec = pltpu.PrefetchScalarGridSpec(
        num_scalar_prefetch=0,
        # Leading axis = sweep index (0: stats, 1: Gram), trailing = N-tiles.
        grid=(2, nb),
        in_specs=[
            pl.BlockSpec((block_n, D), lambda p, i: (i, 0)),
            pl.BlockSpec((block_n, D), lambda p, i: (i, 0)),
        ],
        out_specs=pl.BlockSpec(memory_space=pltpu.MemorySpace.SMEM),
        scratch_shapes=[
            pltpu.VMEM((1, D), jnp.float32),   # s1  (column sums)
            pltpu.VMEM((1, D), jnp.float32),   # q1  (column sums of squares)
            pltpu.VMEM((1, D), jnp.float32),   # s2
            pltpu.VMEM((1, D), jnp.float32),   # q2
            pltpu.VMEM((D, D), jnp.float32),   # g1 = c1 accumulator
            pltpu.VMEM((D, D), jnp.float32),   # g2 = c2 accumulator
            pltpu.VMEM((1, D), jnp.float32),   # per-column cross sums
        ],
    )

    out = pl.pallas_call(
        kernel,
        out_shape=jax.ShapeDtypeStruct((1, 1), jnp.float32),
        grid_spec=grid_spec,
        compiler_params=pltpu.CompilerParams(
            # Both axes carry accumulator state -> reduction semantics.
            dimension_semantics=("arbitrary", "arbitrary")),
    )(z1, z2)
    return out[0, 0]


def _cca_loss_ref(z1, z2, lambda_param=0.001):
    """Pure-JAX reference mirroring the PyTorch forward exactly."""
    z1 = z1.astype(jnp.float32)
    z2 = z2.astype(jnp.float32)
    N, D = z1.shape
    z1n = (z1 - z1.mean(0)) / jnp.std(z1, axis=0, ddof=1)
    z2n = (z2 - z2.mean(0)) / jnp.std(z2, axis=0, ddof=1)
    c1 = (z1n.T @ z1n) / D
    c2 = (z2n.T @ z2n) / D
    loss_inv = jnp.sum((z1n - z2n) ** 2) / D
    iden = jnp.eye(D, dtype=jnp.float32)
    loss_dec1 = jnp.sum((iden - c1) ** 2)
    loss_dec2 = jnp.sum((iden - c2) ** 2)
    return loss_inv + lambda_param * (loss_dec1 + loss_dec2)


if __name__ == "__main__":
    # Small shapes consistent with the module's (batch, hidden) embedding inputs.
    # N=512, block_n=256 -> grid (2, 2): exercises both sweeps and the streaming
    # accumulation while each input stays at 256 KiB (trivially fits v7x VMEM).
    N, D = 512, 128
    key = jax.random.PRNGKey(0)
    k1, k2 = jax.random.split(key)
    z1 = jax.random.normal(k1, (N, D), dtype=jnp.float32)
    z2 = jax.random.normal(k2, (N, D), dtype=jnp.float32)

    loss = jax.block_until_ready(cca_loss(z1, z2, lambda_param=0.001))
    ref = jax.block_until_ready(_cca_loss_ref(z1, z2, lambda_param=0.001))

    assert jnp.allclose(loss, ref, rtol=2e-4, atol=1e-2), (loss, ref)
    print("KERNEL_OK")
</pallas_src>

<mosaic_0001>
module attributes {stable_mosaic.version = 11 : i64} {
  func.func @_cca_loss_kernel(%arg0: i32, %arg1: i32, %arg2: memref<256x128xf32, #tpu.memory_space<vmem>>, %arg3: memref<256x128xf32, #tpu.memory_space<vmem>>, %arg4: memref<1x1xf32, #tpu.memory_space<smem>>, %arg5: memref<1x128xf32, #tpu.memory_space<vmem>>, %arg6: memref<1x128xf32, #tpu.memory_space<vmem>>, %arg7: memref<1x128xf32, #tpu.memory_space<vmem>>, %arg8: memref<1x128xf32, #tpu.memory_space<vmem>>, %arg9: memref<128x128xf32, #tpu.memory_space<vmem>>, %arg10: memref<128x128xf32, #tpu.memory_space<vmem>>, %arg11: memref<1x128xf32, #tpu.memory_space<vmem>>) attributes {dimension_semantics = [#tpu.dimension_semantics<arbitrary>, #tpu.dimension_semantics<arbitrary>], iteration_bounds = array<i64: 2, 2>, scalar_prefetch = 0 : i64, scratch_operands = 7 : i64, tpu.core_type = #tpu.core_type<tc>, window_params = [{transform_indices = @transform_0, window_bounds = array<i64: 256, 128>}, {transform_indices = @transform_1, window_bounds = array<i64: 256, 128>}, {transform_indices = @transform_2, window_bounds = array<i64: 1, 1>}]} {
    %c0_i32 = arith.constant 0 : i32
    %0 = arith.cmpi eq, %arg0, %c0_i32 : i32
    %c0_i32_0 = arith.constant 0 : i32
    %1 = arith.cmpi eq, %arg1, %c0_i32_0 : i32
    %2 = arith.andi %0, %1 : i1
    %3 = arith.extui %2 : i1 to i32
    %c0_i32_1 = arith.constant 0 : i32
    %4 = arith.cmpi ne, %3, %c0_i32_1 : i32
    scf.if %4 {
      %cst = arith.constant 0.000000e+00 : f32
      %18 = vector.broadcast %cst : f32 to vector<1x128xf32>
      %c0_11 = arith.constant 0 : index
      %c0_12 = arith.constant 0 : index
      %19 = vector.load %arg5[%c0_11, %c0_12] : memref<1x128xf32, #tpu.memory_space<vmem>>, vector<1x128xf32>
      tpu.vector_store %arg5[%c0_11, %c0_12], %18 {strides = array<i32>} : memref<1x128xf32, #tpu.memory_space<vmem>>, vector<1x128xf32>,
      %cst_13 = arith.constant 0.000000e+00 : f32
      %20 = vector.broadcast %cst_13 : f32 to vector<1x128xf32>
      %c0_14 = arith.constant 0 : index
      %c0_15 = arith.constant 0 : index
      %21 = vector.load %arg6[%c0_14, %c0_15] : memref<1x128xf32, #tpu.memory_space<vmem>>, vector<1x128xf32>
      tpu.vector_store %arg6[%c0_14, %c0_15], %20 {strides = array<i32>} : memref<1x128xf32, #tpu.memory_space<vmem>>, vector<1x128xf32>,
      %cst_16 = arith.constant 0.000000e+00 : f32
      %22 = vector.broadcast %cst_16 : f32 to vector<1x128xf32>
      %c0_17 = arith.constant 0 : index
      %c0_18 = arith.constant 0 : index
      %23 = vector.load %arg7[%c0_17, %c0_18] : memref<1x128xf32, #tpu.memory_space<vmem>>, vector<1x128xf32>
      tpu.vector_store %arg7[%c0_17, %c0_18], %22 {strides = array<i32>} : memref<1x128xf32, #tpu.memory_space<vmem>>, vector<1x128xf32>,
      %cst_19 = arith.constant 0.000000e+00 : f32
      %24 = vector.broadcast %cst_19 : f32 to vector<1x128xf32>
      %c0_20 = arith.constant 0 : index
      %c0_21 = arith.constant 0 : index
      %25 = vector.load %arg8[%c0_20, %c0_21] : memref<1x128xf32, #tpu.memory_space<vmem>>, vector<1x128xf32>
      tpu.vector_store %arg8[%c0_20, %c0_21], %24 {strides = array<i32>} : memref<1x128xf32, #tpu.memory_space<vmem>>, vector<1x128xf32>,
      %cst_22 = arith.constant 0.000000e+00 : f32
      %26 = vector.broadcast %cst_22 : f32 to vector<128x128xf32>
      %c0_23 = arith.constant 0 : index
      %c0_24 = arith.constant 0 : index
      %27 = vector.load %arg9[%c0_23, %c0_24] : memref<128x128xf32, #tpu.memory_space<vmem>>, vector<128x128xf32>
      tpu.vector_store %arg9[%c0_23, %c0_24], %26 {strides = array<i32>} : memref<128x128xf32, #tpu.memory_space<vmem>>, vector<128x128xf32>,
      %cst_25 = arith.constant 0.000000e+00 : f32
      %28 = vector.broadcast %cst_25 : f32 to vector<128x128xf32>
      %c0_26 = arith.constant 0 : index
      %c0_27 = arith.constant 0 : index
      %29 = vector.load %arg10[%c0_26, %c0_27] : memref<128x128xf32, #tpu.memory_space<vmem>>, vector<128x128xf32>
      tpu.vector_store %arg10[%c0_26, %c0_27], %28 {strides = array<i32>} : memref<128x128xf32, #tpu.memory_space<vmem>>, vector<128x128xf32>,
      %cst_28 = arith.constant 0.000000e+00 : f32
      %30 = vector.broadcast %cst_28 : f32 to vector<1x128xf32>
      %c0_29 = arith.constant 0 : index
      %c0_30 = arith.constant 0 : index
      %31 = vector.load %arg11[%c0_29, %c0_30] : memref<1x128xf32, #tpu.memory_space<vmem>>, vector<1x128xf32>
      tpu.vector_store %arg11[%c0_29, %c0_30], %30 {strides = array<i32>} : memref<1x128xf32, #tpu.memory_space<vmem>>, vector<1x128xf32>,
    } else {
    }
    %c0 = arith.constant 0 : index
    %c0_2 = arith.constant 0 : index
    %5 = vector.load %arg2[%c0, %c0_2] : memref<256x128xf32, #tpu.memory_space<vmem>>, vector<256x128xf32>
    %c0_3 = arith.constant 0 : index
    %c0_4 = arith.constant 0 : index
    %6 = vector.load %arg3[%c0_3, %c0_4] : memref<256x128xf32, #tpu.memory_space<vmem>>, vector<256x128xf32>
    %c0_i32_5 = arith.constant 0 : i32
    %7 = arith.cmpi eq, %arg0, %c0_i32_5 : i32
    %8 = arith.extui %7 : i1 to i32
    %c0_i32_6 = arith.constant 0 : i32
    %9 = arith.cmpi ne, %8, %c0_i32_6 : i32
    scf.if %9 {
      %c0_11 = arith.constant 0 : index
      %c0_12 = arith.constant 0 : index
      %18 = vector.load %arg5[%c0_11, %c0_12] : memref<1x128xf32, #tpu.memory_space<vmem>>, vector<1x128xf32>
      %cst = arith.constant dense<0.000000e+00> : vector<128xf32>
      %19 = vector.multi_reduction <add>, %5, %cst [0] : vector<256x128xf32> to vector<128xf32>
      %20 = vector.shape_cast %19 : vector<128xf32> to vector<1x128xf32>
      %21 = arith.addf %18, %20 : vector<1x128xf32>
      %c0_13 = arith.constant 0 : index
      %c0_14 = arith.constant 0 : index
      %22 = vector.load %arg5[%c0_13, %c0_14] : memref<1x128xf32, #tpu.memory_space<vmem>>, vector<1x128xf32>
      tpu.vector_store %arg5[%c0_13, %c0_14], %21 {strides = array<i32>} : memref<1x128xf32, #tpu.memory_space<vmem>>, vector<1x128xf32>,
      %c0_15 = arith.constant 0 : index
      %c0_16 = arith.constant 0 : index
      %23 = vector.load %arg6[%c0_15, %c0_16] : memref<1x128xf32, #tpu.memory_space<vmem>>, vector<1x128xf32>
      %24 = arith.mulf %5, %5 : vector<256x128xf32>
      %cst_17 = arith.constant dense<0.000000e+00> : vector<128xf32>
      %25 = vector.multi_reduction <add>, %24, %cst_17 [0] : vector<256x128xf32> to vector<128xf32>
      %26 = vector.shape_cast %25 : vector<128xf32> to vector<1x128xf32>
      %27 = arith.addf %23, %26 : vector<1x128xf32>
      %c0_18 = arith.constant 0 : index
      %c0_19 = arith.constant 0 : index
      %28 = vector.load %arg6[%c0_18, %c0_19] : memref<1x128xf32, #tpu.memory_space<vmem>>, vector<1x128xf32>
      tpu.vector_store %arg6[%c0_18, %c0_19], %27 {strides = array<i32>} : memref<1x128xf32, #tpu.memory_space<vmem>>, vector<1x128xf32>,
      %c0_20 = arith.constant 0 : index
      %c0_21 = arith.constant 0 : index
      %29 = vector.load %arg7[%c0_20, %c0_21] : memref<1x128xf32, #tpu.memory_space<vmem>>, vector<1x128xf32>
      %cst_22 = arith.constant dense<0.000000e+00> : vector<128xf32>
      %30 = vector.multi_reduction <add>, %6, %cst_22 [0] : vector<256x128xf32> to vector<128xf32>
      %31 = vector.shape_cast %30 : vector<128xf32> to vector<1x128xf32>
      %32 = arith.addf %29, %31 : vector<1x128xf32>
      %c0_23 = arith.constant 0 : index
      %c0_24 = arith.constant 0 : index
      %33 = vector.load %arg7[%c0_23, %c0_24] : memref<1x128xf32, #tpu.memory_space<vmem>>, vector<1x128xf32>
      tpu.vector_store %arg7[%c0_23, %c0_24], %32 {strides = array<i32>} : memref<1x128xf32, #tpu.memory_space<vmem>>, vector<1x128xf32>,
      %c0_25 = arith.constant 0 : index
      %c0_26 = arith.constant 0 : index
      %34 = vector.load %arg8[%c0_25, %c0_26] : memref<1x128xf32, #tpu.memory_space<vmem>>, vector<1x128xf32>
      %35 = arith.mulf %6, %6 : vector<256x128xf32>
      %cst_27 = arith.constant dense<0.000000e+00> : vector<128xf32>
      %36 = vector.multi_reduction <add>, %35, %cst_27 [0] : vector<256x128xf32> to vector<128xf32>
      %37 = vector.shape_cast %36 : vector<128xf32> to vector<1x128xf32>
      %38 = arith.addf %34, %37 : vector<1x128xf32>
      %c0_28 = arith.constant 0 : index
      %c0_29 = arith.constant 0 : index
      %39 = vector.load %arg8[%c0_28, %c0_29] : memref<1x128xf32, #tpu.memory_space<vmem>>, vector<1x128xf32>
      tpu.vector_store %arg8[%c0_28, %c0_29], %38 {strides = array<i32>} : memref<1x128xf32, #tpu.memory_space<vmem>>, vector<1x128xf32>,
    } else {
    }
    %c1_i32 = arith.constant 1 : i32
    %10 = arith.cmpi eq, %arg0, %c1_i32 : i32
    %11 = arith.extui %10 : i1 to i32
    %c0_i32_7 = arith.constant 0 : i32
    %12 = arith.cmpi ne, %11, %c0_i32_7 : i32
    scf.if %12 {
      %c0_11 = arith.constant 0 : index
      %c0_12 = arith.constant 0 : index
      %18 = vector.load %arg5[%c0_11, %c0_12] : memref<1x128xf32, #tpu.memory_space<vmem>>, vector<1x128xf32>
      %cst = arith.constant 1.000000e+00 : f32
      %cst_13 = arith.constant 5.120000e+02 : f32
      %19 = arith.divf %cst, %cst_13 : f32
      %20 = vector.broadcast %19 : f32 to vector<1x128xf32>
      %21 = arith.mulf %18, %20 : vector<1x128xf32>
      %c0_14 = arith.constant 0 : index
      %c0_15 = arith.constant 0 : index
      %22 = vector.load %arg7[%c0_14, %c0_15] : memref<1x128xf32, #tpu.memory_space<vmem>>, vector<1x128xf32>
      %cst_16 = arith.constant 1.000000e+00 : f32
      %cst_17 = arith.constant 5.120000e+02 : f32
      %23 = arith.divf %cst_16, %cst_17 : f32
      %24 = vector.broadcast %23 : f32 to vector<1x128xf32>
      %25 = arith.mulf %22, %24 : vector<1x128xf32>
      %c0_18 = arith.constant 0 : index
      %c0_19 = arith.constant 0 : index
      %26 = vector.load %arg6[%c0_18, %c0_19] : memref<1x128xf32, #tpu.memory_space<vmem>>, vector<1x128xf32>
      %cst_20 = arith.constant 5.120000e+02 : f32
      %27 = vector.broadcast %cst_20 : f32 to vector<1x128xf32>
      %28 = arith.mulf %27, %21 : vector<1x128xf32>
      %29 = arith.mulf %28, %21 : vector<1x128xf32>
      %30 = arith.subf %26, %29 : vector<1x128xf32>
      %cst_21 = arith.constant 5.120000e+02 : f32
      %cst_22 = arith.constant 1.000000e+00 : f32
      %31 = arith.subf %cst_21, %cst_22 : f32
      %cst_23 = arith.constant 1.000000e+00 : f32
      %32 = arith.divf %cst_23, %31 : f32
      %33 = vector.broadcast %32 : f32 to vector<1x128xf32>
      %34 = arith.mulf %30, %33 : vector<1x128xf32>
      %c0_24 = arith.constant 0 : index
      %c0_25 = arith.constant 0 : index
      %35 = vector.load %arg8[%c0_24, %c0_25] : memref<1x128xf32, #tpu.memory_space<vmem>>, vector<1x128xf32>
      %cst_26 = arith.constant 5.120000e+02 : f32
      %36 = vector.broadcast %cst_26 : f32 to vector<1x128xf32>
      %37 = arith.mulf %36, %25 : vector<1x128xf32>
      %38 = arith.mulf %37, %25 : vector<1x128xf32>
      %39 = arith.subf %35, %38 : vector<1x128xf32>
      %cst_27 = arith.constant 5.120000e+02 : f32
      %cst_28 = arith.constant 1.000000e+00 : f32
      %40 = arith.subf %cst_27, %cst_28 : f32
      %cst_29 = arith.constant 1.000000e+00 : f32
      %41 = arith.divf %cst_29, %40 : f32
      %42 = vector.broadcast %41 : f32 to vector<1x128xf32>
      %43 = arith.mulf %39, %42 : vector<1x128xf32>
      %cst_30 = arith.constant 1.280000e+02 : f32
      %44 = vector.broadcast %cst_30 : f32 to vector<1x128xf32>
      %45 = arith.mulf %34, %44 : vector<1x128xf32>
      %46 = math.rsqrt %45 : vector<1x128xf32>
      %cst_31 = arith.constant 1.280000e+02 : f32
      %47 = vector.broadcast %cst_31 : f32 to vector<1x128xf32>
      %48 = arith.mulf %43, %47 : vector<1x128xf32>
      %49 = math.rsqrt %48 : vector<1x128xf32>
      %50 = vector.broadcast %21 : vector<1x128xf32> to vector<256x128xf32>
      %51 = arith.subf %5, %50 : vector<256x128xf32>
      %52 = vector.broadcast %46 : vector<1x128xf32> to vector<256x128xf32>
      %53 = arith.mulf %51, %52 : vector<256x128xf32>
      %54 = vector.broadcast %25 : vector<1x128xf32> to vector<256x128xf32>
      %55 = arith.subf %6, %54 : vector<256x128xf32>
      %56 = vector.broadcast %49 : vector<1x128xf32> to vector<256x128xf32>
      %57 = arith.mulf %55, %56 : vector<256x128xf32>
      %c0_32 = arith.constant 0 : index
      %c0_33 = arith.constant 0 : index
      %58 = vector.load %arg9[%c0_32, %c0_33] : memref<128x128xf32, #tpu.memory_space<vmem>>, vector<128x128xf32>
      %cst_34 = arith.constant dense<0.000000e+00> : vector<128x128xf32>
      %59 = tpu.matmul %53, %53, %cst_34 {dimension_numbers = #tpu.dot_dimension_numbers<[0], [0], [1], [1], [0, 1, 1, 1], [], []>} : vector<256x128xf32>, vector<256x128xf32>, vector<128x128xf32> -> vector<128x128xf32>
      %60 = arith.addf %58, %59 : vector<128x128xf32>
      %c0_35 = arith.constant 0 : index
      %c0_36 = arith.constant 0 : index
      %61 = vector.load %arg9[%c0_35, %c0_36] : memref<128x128xf32, #tpu.memory_space<vmem>>, vector<128x128xf32>
      tpu.vector_store %arg9[%c0_35, %c0_36], %60 {strides = array<i32>} : memref<128x128xf32, #tpu.memory_space<vmem>>, vector<128x128xf32>,
      %c0_37 = arith.constant 0 : index
      %c0_38 = arith.constant 0 : index
      %62 = vector.load %arg10[%c0_37, %c0_38] : memref<128x128xf32, #tpu.memory_space<vmem>>, vector<128x128xf32>
      %cst_39 = arith.constant dense<0.000000e+00> : vector<128x128xf32>
      %63 = tpu.matmul %57, %57, %cst_39 {dimension_numbers = #tpu.dot_dimension_numbers<[0], [0], [1], [1], [0, 1, 1, 1], [], []>} : vector<256x128xf32>, vector<256x128xf32>, vector<128x128xf32> -> vector<128x128xf32>
      %64 = arith.addf %62, %63 : vector<128x128xf32>
      %c0_40 = arith.constant 0 : index
      %c0_41 = arith.constant 0 : index
      %65 = vector.load %arg10[%c0_40, %c0_41] : memref<128x128xf32, #tpu.memory_space<vmem>>, vector<128x128xf32>
      tpu.vector_store %arg10[%c0_40, %c0_41], %64 {strides = array<i32>} : memref<128x128xf32, #tpu.memory_space<vmem>>, vector<128x128xf32>,
      %c0_42 = arith.constant 0 : index
      %c0_43 = arith.constant 0 : index
      %66 = vector.load %arg11[%c0_42, %c0_43] : memref<1x128xf32, #tpu.memory_space<vmem>>, vector<1x128xf32>
      %67 = arith.mulf %53, %57 : vector<256x128xf32>
      %cst_44 = arith.constant dense<0.000000e+00> : vector<128xf32>
      %68 = vector.multi_reduction <add>, %67, %cst_44 [0] : vector<256x128xf32> to vector<128xf32>
      %69 = vector.shape_cast %68 : vector<128xf32> to vector<1x128xf32>
      %70 = arith.addf %66, %69 : vector<1x128xf32>
      %c0_45 = arith.constant 0 : index
      %c0_46 = arith.constant 0 : index
      %71 = vector.load %arg11[%c0_45, %c0_46] : memref<1x128xf32, #tpu.memory_space<vmem>>, vector<1x128xf32>
      tpu.vector_store %arg11[%c0_45, %c0_46], %70 {strides = array<i32>} : memref<1x128xf32, #tpu.memory_space<vmem>>, vector<1x128xf32>,
    } else {
    }
    %c1_i32_8 = arith.constant 1 : i32
    %13 = arith.cmpi eq, %arg0, %c1_i32_8 : i32
    %c1_i32_9 = arith.constant 1 : i32
    %14 = arith.cmpi eq, %arg1, %c1_i32_9 : i32
    %15 = arith.andi %13, %14 : i1
    %16 = arith.extui %15 : i1 to i32
    %c0_i32_10 = arith.constant 0 : i32
    %17 = arith.cmpi ne, %16, %c0_i32_10 : i32
    scf.if %17 {
      %c0_11 = arith.constant 0 : index
      %c0_12 = arith.constant 0 : index
      %18 = vector.load %arg9[%c0_11, %c0_12] : memref<128x128xf32, #tpu.memory_space<vmem>>, vector<128x128xf32>
      %c0_13 = arith.constant 0 : index
      %c0_14 = arith.constant 0 : index
      %19 = vector.load %arg10[%c0_13, %c0_14] : memref<128x128xf32, #tpu.memory_space<vmem>>, vector<128x128xf32>
      %20 = arith.mulf %18, %18 : vector<128x128xf32>
      %21 = vector.shape_cast %20 : vector<128x128xf32> to vector<1x128x128xf32>
      %cst = arith.constant dense<0.000000e+00> : vector<1xf32>
      %22 = vector.multi_reduction <add>, %21, %cst [1, 2] : vector<1x128x128xf32> to vector<1xf32>
      %23 = vector.shape_cast %22 : vector<1xf32> to vector<1x1x1xf32>
      %24 = vector.extract %23[0, 0, 0] : f32 from vector<1x1x1xf32>
      %cst_15 = arith.constant 5.120000e+02 : f32
      %cst_16 = arith.constant 1.000000e+00 : f32
      %25 = arith.subf %cst_15, %cst_16 : f32
      %cst_17 = arith.constant 2.000000e+00 : f32
      %26 = arith.mulf %cst_17, %25 : f32
      %27 = arith.subf %24, %26 : f32
      %cst_18 = arith.constant 1.280000e+02 : f32
      %28 = arith.addf %27, %cst_18 : f32
      %29 = arith.mulf %19, %19 : vector<128x128xf32>
      %30 = vector.shape_cast %29 : vector<128x128xf32> to vector<1x128x128xf32>
      %cst_19 = arith.constant dense<0.000000e+00> : vector<1xf32>
      %31 = vector.multi_reduction <add>, %30, %cst_19 [1, 2] : vector<1x128x128xf32> to vector<1xf32>
      %32 = vector.shape_cast %31 : vector<1xf32> to vector<1x1x1xf32>
      %33 = vector.extract %32[0, 0, 0] : f32 from vector<1x1x1xf32>
      %cst_20 = arith.constant 5.120000e+02 : f32
      %cst_21 = arith.constant 1.000000e+00 : f32
      %34 = arith.subf %cst_20, %cst_21 : f32
      %cst_22 = arith.constant 2.000000e+00 : f32
      %35 = arith.mulf %cst_22, %34 : f32
      %36 = arith.subf %33, %35 : f32
      %cst_23 = arith.constant 1.280000e+02 : f32
      %37 = arith.addf %36, %cst_23 : f32
      %cst_24 = arith.constant 5.120000e+02 : f32
      %cst_25 = arith.constant 1.000000e+00 : f32
      %38 = arith.subf %cst_24, %cst_25 : f32
      %cst_26 = arith.constant 2.000000e+00 : f32
      %39 = arith.mulf %cst_26, %38 : f32
      %c0_27 = arith.constant 0 : index
      %c0_28 = arith.constant 0 : index
      %40 = vector.load %arg11[%c0_27, %c0_28] : memref<1x128xf32, #tpu.memory_space<vmem>>, vector<1x128xf32>
      %41 = vector.shape_cast %40 : vector<1x128xf32> to vector<1x1x128xf32>
      %cst_29 = arith.constant dense<0.000000e+00> : vector<1xf32>
      %42 = vector.multi_reduction <add>, %41, %cst_29 [1, 2] : vector<1x1x128xf32> to vector<1xf32>
      %43 = vector.shape_cast %42 : vector<1xf32> to vector<1x1x1xf32>
      %44 = vector.extract %43[0, 0, 0] : f32 from vector<1x1x1xf32>
      %cst_30 = arith.constant 2.000000e+00 : f32
      %45 = arith.mulf %cst_30, %44 : f32
      %46 = arith.subf %39, %45 : f32
      %47 = arith.addf %28, %37 : f32
      %cst_31 = arith.constant 1.000000e-03 : f32
      %48 = arith.mulf %cst_31, %47 : f32
      %49 = arith.addf %46, %48 : f32
      %c0_32 = arith.constant 0 : index
      %c0_33 = arith.constant 0 : index
      %50 = memref.load %arg4[%c0_32, %c0_33] : memref<1x1xf32, #tpu.memory_space<smem>>
      memref.store %49, %arg4[%c0_32, %c0_33] : memref<1x1xf32, #tpu.memory_space<smem>>
    } else {
    }
    return
  }
  func.func @transform_0(%arg0: i32, %arg1: i32) -> (i32, i32) {
    %c0_i32 = arith.constant 0 : i32
    %c0_i32_0 = arith.constant 0 : i32
    return %arg1, %c0_i32 : i32, i32
  }
  func.func @transform_1(%arg0: i32, %arg1: i32) -> (i32, i32) {
    %c0_i32 = arith.constant 0 : i32
    %c0_i32_0 = arith.constant 0 : i32
    return %arg1, %c0_i32 : i32, i32
  }
  func.func @transform_2(%arg0: i32, %arg1: i32) -> (i32, i32) {
    %c0_i32 = arith.constant 0 : i32
    %c0_i32_0 = arith.constant 0 : i32
    %c0_i32_1 = arith.constant 0 : i32
    return %c0_i32, %c0_i32_0 : i32, i32
  }
}

</mosaic_0001>

<bundles_post_ra>
// kernel: tpu_custom_call.1
= control target key start
LH: loop header
LB: loop body
LE: loop exit
PB: predicated region body
PF: predicated region fallthrough
CT: control target
= control target key end

     0   :  { %7 = vsyncpa [#allocation10], 0  ;;  %s3427_s0 = inlined_call_operand.hbm [shape: f32[512,128], index: 0, kind: input, shape index: {}]   ;;  %s3428_s1 = inlined_call_operand.hbm [shape: f32[512,128], index: 1, kind: input, shape index: {}]   ;;  %s3429_s2 = inlined_call_operand.hbm [shape: f32[1,1], index: 2, kind: output, shape index: {}]  }
   0x1   :  { %9 = vsyncpa [#allocation10 + $0x1], 0 }
   0x2   :  { %10 = vsyncpa [#allocation13], 0 }
   0x3   :  { %12 = vsyncpa [#allocation13 + $0x1], 0 }
   0x4   :  { %13 = vsyncpa [#allocation11], 0  ;;  %s2264_s9 = smov 0   ;;  %s2266_s10 = smov 0  }
   0x5   :  { %s2268_s11 = smov 0   ;;  %s2270_s12 = smov 0  }
   0x6   :  { %s2272_s13 = smov 0   ;;  %s2274_s14 = smov 0  }
   0x7   :  { %s2276_s15 = smov 0   ;;  %s2278_s16 = smov 0  }
   0x8 LB: > { %s1529_s17 = sadd.s32 4294967295, %s2241_s16   ;;  %s28_s18 = sadd.s32 1, %s2233_s14  ;;  %s2241_s16 = sphi %s2278_s16, %s19_s16   ;;  %s2237_s15 = sphi %s2276_s15, %s3614_s15   ;;  %s2233_s14 = sphi %s2274_s14, %s3613_s14   ;;  %s2229_s13 = sphi %s2272_s13, %s3612_s13   ;;  %s2225_s12 = sphi %s2270_s12, %s3611_s12   ;;  %s2221_s11 = sphi %s2268_s11, %s3610_s11   ;;  %s2217_s10 = sphi %s2266_s10, %s3609_s10   ;;  %s2213_s9 = sphi %s2264_s9, %s3608_s9  }
   0x9   : > { %p29_p0 = scmp.ge.s32.totalorder %s28_s18, 2  ;;  %s31_s19 = sadd.s32 1, %s2237_s15 }
   0xa   : > { %s38_s20 = sadd.s32 1, %s2221_s11  ;;  %p45_p1 = scmp.ne.s32.totalorder %s2221_s11, %s2217_s10 }
   0xb   : > { %s3616_s18 = smov (%p29_p0, %s28_s18), 0  ;;  %s3618_s19 = smov (!%p29_p0, %s31_s19), %s2237_s15 }
   0xc   : > { %s35_s21 = ssub.s32 %s2233_s14, %s3616_s18  ;;  %p46_p2 = scmp.eq.s32.totalorder %s2241_s16, 0 }
   0xd   : > { %p33_p3 = scmp.ge.s32.totalorder %s3618_s19, 2  ;;  %p36_p4 = scmp.eq.s32.totalorder %s35_s21, 0 }
   0xe   : > { %p2314_p5 = por %p46_p2, %p45_p1  ;;  %p51_p6 = scmp.ne.s32.totalorder %s2217_s10, %s2213_s9 }
   0xf   : > { %s3620_s19 = smov (%p33_p3, %s3618_s19), 0  ;;  %p52_p7 = scmp.eq.s32.totalorder %s1529_s17, 0 }
  0x10   : > { %s2322_s23 = scalar_select %p36_p4, %s2221_s11, %s38_s20  }
  0x11   : > { %p1796_p8 = scmp.lt.s32.totalorder %s2241_s16, 4  ;;  %s2328_s24 = sand.u32 1, %s2221_s11  }
  0x12   : > { %p2330_p9 = por %p52_p7, %p51_p6  ;;  %s1532_s26 = sshll.u32 %s2328_s24, 8 }
  0x13   : > { %s1549_s27 = sshll.u32 %s2233_s14, 12  ;;  %s126_s3 = scalar_lea.vmem [#allocation9], %s1532_s26 }
  0x14   : > { %s3491_s25 = scalar_select %p2330_p9, 1, 0 }
  0x15   : > { %s2341_s30 = scalar_lea.hbm %s3427_s0, %s1549_s27  ;;  %s133_s4 = sshll.u32 %s126_s3, 4  ;;  %s2351_s4 = int_to_ptr.vmem [resolvable:$true] %s133_s4 }
  0x16   : > { %p2347_p10 = pnand %p1796_p8, %p2314_p5  ;;  %s123_s6 = scalar_lea.sflag [#allocation10], %s2328_s24 }
  0x17   : > { %s2095_s7 = scalar_lea.hbm %s2341_s30, 4096  ;;  %s2100_s20 = scalar_lea.hbm %s3427_s0, 8192 }
  0x18   : > { %p2096_p11 = scmp.ne.s32.totalorder %s2341_s30, %s2095_s7  ;;  %p2097_p12 = pneg %p2347_p10 }
  0x19   : > { %p2101_p1 = scmp.lt.u32.totalorder %s2341_s30, %s3427_s0  ;;  %p2102_p2 = scmp.lt.u32.totalorder %s2100_s20, %s2095_s7 }
  0x1a   : > { %p2098_p13 = pnand %p2097_p12, %p2096_p11  ;;  %p2104_p4 = scmp.lt.u32.totalorder %s2095_s7, %s2341_s30 }
  0x1b   : > { %p2103_p3 = por %p2102_p2, %p2101_p1 }
  0x1c   : > { %p2099_p0 = pneg %p2098_p13 }
  0x1d   : > { %p2105_p5 = por %p2104_p4, %p2103_p3 }
  0x1f   : > { %p2106_p6 = pnand %p2105_p5, %p2099_p0 }
  0x21   : > { %2109 = shalt.err (!%p2106_p6)
}
  0x22   : > { %s2110_s28 = scalar_lea.vmem %s2351_s4, 4096  ;;  %s2243_s29 = smov [#allocation9]  }
  0x23   : > { %p2111_p7 = scmp.ne.s32.totalorder %s2351_s4, %s2110_s28  ;;  %s2115_s3 = sshll.u32 %s2243_s29, 4  ;;  %s2116_s3 = int_to_ptr.vmem [resolvable:$false] %s2115_s3 }
  0x24   : > { %s2117_s8 = scalar_lea.vmem %s2116_s3, 8192  ;;  %p2118_p13 = scmp.lt.s32.totalorder %s2351_s4, %s2116_s3 }
  0x25   : > { %p2113_p8 = pnand %p2111_p7, %p2097_p12  ;;  %p2119_p1 = scmp.lt.s32.totalorder %s2117_s8, %s2110_s28 }
  0x27   : > { %p2114_p11 = pneg %p2113_p8  ;;  %p2120_p2 = por %p2119_p1, %p2118_p13 }
  0x29   : > { %p2121_p3 = pnand %p2120_p2, %p2114_p11 }
  0x2b   : > { %2124 = shalt.err (!%p2121_p3)
}
  0x2c   : > { %s2244_s7 = smov 128   ;;  %s2245_s9 = smov 8  }
  0x2d   : > { %1792 = dma.hbm_to_vmem [thread:$0]  (!%p2347_p10), %s2341_s30, 4096, %s2351_s4, %s123_s6, %s2244_s7, %s2244_s7, %s2245_s9  }
  0x2e   : > { %p1538_p0 = scmp.ge.s32.totalorder %s2241_s16, 1  ;;  %p162_p4 = scmp.lt.s32.totalorder %s2241_s16, 5 }
  0x2f   : > { %s2395_s28 = scalar_lea.hbm %s3428_s1, %s1549_s27  ;;  %s147_s29 = scalar_lea.vmem [#allocation12], %s1532_s26 }
  0x30   : > { %p2386_p5 = pnand %p1538_p0, %p162_p4  ;;  %s154_s3 = sshll.u32 %s147_s29, 4  ;;  %s2399_s3 = int_to_ptr.vmem [resolvable:$true] %s154_s3 }
  0x31   : > { %s144_s30 = scalar_lea.sflag [#allocation13], %s2328_s24  ;;  %s2125_s4 = scalar_lea.hbm %s2395_s28, 4096 }
  0x32   : > { %p2126_p6 = scmp.ne.s32.totalorder %s2395_s28, %s2125_s4  ;;  %s2130_s27 = scalar_lea.hbm %s3428_s1, 8192 }
  0x33   : > { %p2131_p11 = scmp.lt.u32.totalorder %s2395_s28, %s3428_s1  ;;  %p2132_p13 = scmp.lt.u32.totalorder %s2130_s27, %s2125_s4 }
  0x34   : > { %p2128_p7 = pnand %p2126_p6, %p2097_p12  ;;  %p2134_p2 = scmp.lt.u32.totalorder %s2125_s4, %s2395_s28 }
  0x35   : > { %p2133_p1 = por %p2132_p13, %p2131_p11 }
  0x36   : > { %p2129_p8 = pneg %p2128_p7 }
  0x37   : > { %p2135_p3 = por %p2134_p2, %p2133_p1 }
  0x39   : > { %p2136_p0 = pnand %p2135_p3, %p2129_p8 }
  0x3b   : > { %2139 = shalt.err (!%p2136_p0)
}
  0x3c   : > { %s2140_s26 = scalar_lea.vmem %s2399_s3, 4096  ;;  %s2246_s29 = smov [#allocation12]  }
  0x3d   : > { %p2141_p4 = scmp.ne.s32.totalorder %s2399_s3, %s2140_s26  ;;  %s2145_s6 = sshll.u32 %s2246_s29, 4  ;;  %s2146_s6 = int_to_ptr.vmem [resolvable:$false] %s2145_s6 }
  0x3e   : > { %s2147_s8 = scalar_lea.vmem %s2146_s6, 8192  ;;  %p2148_p9 = scmp.lt.s32.totalorder %s2399_s3, %s2146_s6 }
  0x3f   : > { %p2143_p6 = pnand %p2141_p4, %p2097_p12  ;;  %p2149_p11 = scmp.lt.s32.totalorder %s2147_s8, %s2140_s26 }
  0x41   : > { %p2144_p7 = pneg %p2143_p6  ;;  %p2150_p13 = por %p2149_p11, %p2148_p9 }
  0x43   : > { %p2151_p1 = pnand %p2150_p13, %p2144_p7 }
  0x45   : > { %2154 = shalt.err (!%p2151_p1)
}
  0x46   : > { %1795 = dma.hbm_to_vmem [thread:$0]  (!%p2347_p10), %s2395_s28, 4096, %s2399_s3, %s144_s30, %s2244_s7, %s2244_s7, %s2245_s9  }
  0x47   : > { %166 = sbr.rel (%p2386_p5) target bundleno = 942 (0x3ae), region = 28 }
  0x4e   : > { %s168_s4 = sand.u32 1, %s2217_s10   ;;  %p3494_p9 = scmp.ne.s32.totalorder %s3491_s25, 0 }
  0x4f   : > { %s1539_s27 = sshll.u32 %s168_s4, 8  ;;  %s169_s21 = scalar_lea.sflag [#allocation10], %s168_s4 }
  0x50   : > { %s2433_s22 = scalar_lea.vmem [#allocation9], %s1539_s27 }
  0x51   : > { %2200 = dma.done.wait (%p3494_p9), %s169_s21, 4096  }
  0x52   : > { %2202 = vsyncadd (%p3494_p9), %s169_s21, 4294963200  ;;  %s178_s24 = scalar_lea.sflag [#allocation13], %s168_s4  ;;  %s2439_s5 = scalar_lea.vmem [#allocation12], %s1539_s27 }
  0x53   : > { %2204 = dma.done.wait (%p3494_p9), %s178_s24, 4096  }
  0x54   : > { %2206 = vsyncadd (%p3494_p9), %s178_s24, 4294963200  ;;  %p204_p10 = scmp.eq.s32.totalorder %s2229_s13, 0  ;;  %p205_p12 = scmp.eq.s32.totalorder %s2225_s12, 0 }
  0x56   : > { %p206_p5 = pnand %p205_p12, %p204_p10 }
  0x57   : > { %v2247_v0 = vmov (!%p206_p5), 0.0  }
  0x58   : > { %209 = sbr.rel (%p206_p5) target bundleno = 107 (0x6b), region = 40  ;;  %210 = vst [vmem:[#allocation2] sm:$0x1] (!%p206_p5), %v2247_v0  ;;  %211 = vst [vmem:[#allocation3] sm:$0x1] (!%p206_p5), %v2247_v0 }
  0x59   : > { %212 = vst [vmem:[#allocation4] sm:$0x1] (!%p206_p5), %v2247_v0  ;;  %213 = vst [vmem:[#allocation5] sm:$0x1] (!%p206_p5), %v2247_v0 }
  0x5a   : > { %214 = vst [vmem:[#allocation6] sm:$0xff] (!%p206_p5), %v2247_v0  ;;  %215 = vst [vmem:[#allocation6 + $0x8] sm:$0xff] (!%p206_p5), %v2247_v0 }
  0x5b   : > { %216 = vst [vmem:[#allocation6 + $0x10] sm:$0xff] (!%p206_p5), %v2247_v0  ;;  %217 = vst [vmem:[#allocation6 + $0x18] sm:$0xff] (!%p206_p5), %v2247_v0 }
  0x5c   : > { %218 = vst [vmem:[#allocation6 + $0x20] sm:$0xff] (!%p206_p5), %v2247_v0  ;;  %219 = vst [vmem:[#allocation6 + $0x28] sm:$0xff] (!%p206_p5), %v2247_v0 }
  0x5d   : > { %220 = vst [vmem:[#allocation6 + $0x30] sm:$0xff] (!%p206_p5), %v2247_v0  ;;  %221 = vst [vmem:[#allocation6 + $0x38] sm:$0xff] (!%p206_p5), %v2247_v0 }
  0x5e   : > { %222 = vst [vmem:[#allocation6 + $0x40] sm:$0xff] (!%p206_p5), %v2247_v0  ;;  %223 = vst [vmem:[#allocation6 + $0x48] sm:$0xff] (!%p206_p5), %v2247_v0 }
  0x5f   : > { %224 = vst [vmem:[#allocation6 + $0x50] sm:$0xff] %v2247_v0  ;;  %225 = vst [vmem:[#allocation6 + $0x58] sm:$0xff] %v2247_v0 }
  0x60   : > { %226 = vst [vmem:[#allocation6 + $0x60] sm:$0xff] %v2247_v0  ;;  %227 = vst [vmem:[#allocation6 + $0x68] sm:$0xff] %v2247_v0 }
  0x61   : > { %228 = vst [vmem:[#allocation6 + $0x70] sm:$0xff] %v2247_v0  ;;  %229 = vst [vmem:[#allocation6 + $0x78] sm:$0xff] %v2247_v0 }
  0x62   : > { %230 = vst [vmem:[#allocation7] sm:$0xff] %v2247_v0  ;;  %231 = vst [vmem:[#allocation7 + $0x8] sm:$0xff] %v2247_v0 }
  0x63   : > { %232 = vst [vmem:[#allocation7 + $0x10] sm:$0xff] %v2247_v0  ;;  %233 = vst [vmem:[#allocation7 + $0x18] sm:$0xff] %v2247_v0 }
  0x64   : > { %234 = vst [vmem:[#allocation7 + $0x20] sm:$0xff] %v2247_v0  ;;  %235 = vst [vmem:[#allocation7 + $0x28] sm:$0xff] %v2247_v0 }
  0x65   : > { %236 = vst [vmem:[#allocation7 + $0x30] sm:$0xff] %v2247_v0  ;;  %237 = vst [vmem:[#allocation7 + $0x38] sm:$0xff] %v2247_v0 }
  0x66   : > { %238 = vst [vmem:[#allocation7 + $0x40] sm:$0xff] %v2247_v0  ;;  %239 = vst [vmem:[#allocation7 + $0x48] sm:$0xff] %v2247_v0 }
  0x67   : > { %240 = vst [vmem:[#allocation7 + $0x50] sm:$0xff] %v2247_v0  ;;  %241 = vst [vmem:[#allocation7 + $0x58] sm:$0xff] %v2247_v0 }
  0x68   : > { %242 = vst [vmem:[#allocation7 + $0x60] sm:$0xff] %v2247_v0  ;;  %243 = vst [vmem:[#allocation7 + $0x68] sm:$0xff] %v2247_v0 }
  0x69   : > { %244 = vst [vmem:[#allocation7 + $0x70] sm:$0xff] %v2247_v0  ;;  %245 = vst [vmem:[#allocation7 + $0x78] sm:$0xff] %v2247_v0 }
  0x6a   : > { %246 = vst [vmem:[#allocation8] sm:$0x1] %v2247_v0 }
  0x6b PF: > { %v2448_v1 = vld [vmem:[%s2433_s22] sm:$0xff]  ;;  %v2451_v2 = vld [vmem:[%s2433_s22 + $0x8] sm:$0xff]  ;;  %v2454_v3 = vld [vmem:[%s2433_s22 + $0x10] sm:$0xff]  ;;  %p1541_p8 = scmp.ne.s32.totalorder %s2229_s13, 0 }
  0x6c   : > { %3495 = vst [vmem:[#allocation18_spill] sm:$0xff] %v2448_v1  ;;  %3496 = vst [vmem:[#allocation19_spill] sm:$0xff] %v2451_v2  ;;  %v2457_v4 = vld [vmem:[%s2433_s22 + $0x18] sm:$0xff]  ;;  %v2460_v5 = vld [vmem:[%s2433_s22 + $0x20] sm:$0xff] }
  0x6d   : > { %3497 = vst [vmem:[#allocation20_spill] sm:$0xff] %v2454_v3  ;;  %3498 = vst [vmem:[#allocation21_spill] sm:$0xff] %v2457_v4  ;;  %v2463_v6 = vld [vmem:[%s2433_s22 + $0x28] sm:$0xff]  ;;  %v2466_v7 = vld [vmem:[%s2433_s22 + $0x30] sm:$0xff] }
  0x6e   : > { %v2469_v8 = vld [vmem:[%s2433_s22 + $0x38] sm:$0xff]  ;;  %v2472_v9 = vld [vmem:[%s2433_s22 + $0x40] sm:$0xff]  ;;  %v2475_v10 = vld [vmem:[%s2433_s22 + $0x48] sm:$0xff] }
  0x6f   : > { %3499 = vst [vmem:[#allocation22_spill] sm:$0xff] %v2469_v8  ;;  %3500 = vst [vmem:[#allocation23_spill] sm:$0xff] %v2472_v9  ;;  %v2478_v11 = vld [vmem:[%s2433_s22 + $0x50] sm:$0xff]  ;;  %v2481_v12 = vld [vmem:[%s2433_s22 + $0x58] sm:$0xff] }
  0x70   : > { %3501 = vst [vmem:[#allocation24_spill] sm:$0xff] %v2475_v10  ;;  %3502 = vst [vmem:[#allocation25_spill] sm:$0xff] %v2481_v12  ;;  %v2484_v13 = vld [vmem:[%s2433_s22 + $0x60] sm:$0xff]  ;;  %v2487_v14 = vld [vmem:[%s2433_s22 + $0x68] sm:$0xff] }
  0x71   : > { %3503 = vst [vmem:[#allocation26_spill] sm:$0xff] %v2484_v13  ;;  %3504 = vst [vmem:[#allocation27_spill] sm:$0xff] %v2487_v14  ;;  %v2490_v15 = vld [vmem:[%s2433_s22 + $0x70] sm:$0xff]  ;;  %v2493_v16 = vld [vmem:[%s2433_s22 + $0x78] sm:$0xff] }
  0x72   : > { %3505 = vst [vmem:[#allocation28_spill] sm:$0xff] %v2490_v15  ;;  %3506 = vst [vmem:[#allocation29_spill] sm:$0xff] %v2493_v16  ;;  %v2496_v17 = vld [vmem:[%s2433_s22 + $0x80] sm:$0xff]  ;;  %v2499_v18 = vld [vmem:[%s2433_s22 + $0x88] sm:$0xff] }
  0x73   : > { %v2502_v19 = vld [vmem:[%s2433_s22 + $0x90] sm:$0xff]  ;;  %v2505_v20 = vld [vmem:[%s2433_s22 + $0x98] sm:$0xff]  ;;  %v2508_v21 = vld [vmem:[%s2433_s22 + $0xa0] sm:$0xff] }
  0x74   : > { %v2511_v22 = vld [vmem:[%s2433_s22 + $0xa8] sm:$0xff]  ;;  %v2514_v23 = vld [vmem:[%s2433_s22 + $0xb0] sm:$0xff]  ;;  %v2517_v24 = vld [vmem:[%s2433_s22 + $0xb8] sm:$0xff] }
  0x75   : > { %v2520_v25 = vld [vmem:[%s2433_s22 + $0xc0] sm:$0xff]  ;;  %v2523_v26 = vld [vmem:[%s2433_s22 + $0xc8] sm:$0xff]  ;;  %v2526_v27 = vld [vmem:[%s2433_s22 + $0xd0] sm:$0xff] }
  0x76   : > { %v2529_v28 = vld [vmem:[%s2433_s22 + $0xd8] sm:$0xff]  ;;  %v2532_v29 = vld [vmem:[%s2433_s22 + $0xe0] sm:$0xff]  ;;  %v2535_v30 = vld [vmem:[%s2433_s22 + $0xe8] sm:$0xff] }
  0x77   : > { %3507 = vst [vmem:[#allocation30_spill] sm:$0xff] %v2529_v28  ;;  %3508 = vst [vmem:[#allocation31_spill] sm:$0xff] %v2532_v29  ;;  %v2538_v31 = vld [vmem:[%s2433_s22 + $0xf0] sm:$0xff]  ;;  %v2541_v32 = vld [vmem:[%s2433_s22 + $0xf8] sm:$0xff] }
  0x78   : > { %3509 = vst [vmem:[#allocation32_spill] sm:$0xff] %v2535_v30  ;;  %3510 = vst [vmem:[#allocation33_spill] sm:$0xff] %v2538_v31  ;;  %v2544_v33 = vld [vmem:[%s2439_s5] sm:$0xff]  ;;  %v2547_v34 = vld [vmem:[%s2439_s5 + $0x8] sm:$0xff] }
  0x79   : > { %3511 = vst [vmem:[#allocation34_spill] sm:$0xff] %v2541_v32  ;;  %v2550_v35 = vld [vmem:[%s2439_s5 + $0x10] sm:$0xff]  ;;  %v2553_v36 = vld [vmem:[%s2439_s5 + $0x18] sm:$0xff]  ;;  %v2556_v37 = vld [vmem:[%s2439_s5 + $0x20] sm:$0xff]  ;;  %v315_v32 = vadd.f32 (!%p1541_p8), %v2451_v2, %v2448_v1 }
  0x7a   : > { %v2559_v38 = vld [vmem:[%s2439_s5 + $0x28] sm:$0xff]  ;;  %v2562_v39 = vld [vmem:[%s2439_s5 + $0x30] sm:$0xff]  ;;  %v2565_v40 = vld [vmem:[%s2439_s5 + $0x38] sm:$0xff] }
  0x7b   : > { %v2568_v41 = vld [vmem:[%s2439_s5 + $0x40] sm:$0xff]  ;;  %v2571_v42 = vld [vmem:[%s2439_s5 + $0x48] sm:$0xff]  ;;  %v2574_v43 = vld [vmem:[%s2439_s5 + $0x50] sm:$0xff]  ;;  %v316_v31 = vadd.f32 (!%p1541_p8), %v315_v32, %v2454_v3 }
  0x7c   : > { %v2577_v44 = vld [vmem:[%s2439_s5 + $0x58] sm:$0xff]  ;;  %v2580_v45 = vld [vmem:[%s2439_s5 + $0x60] sm:$0xff]  ;;  %v2583_v46 = vld [vmem:[%s2439_s5 + $0x68] sm:$0xff] }
  0x7d   : > { %3512 = vst [vmem:[#allocation35_spill] sm:$0xff] %v2577_v44  ;;  %3513 = vst [vmem:[#allocation36_spill] sm:$0xff] %v2580_v45  ;;  %v2586_v47 = vld [vmem:[%s2439_s5 + $0x70] sm:$0xff]  ;;  %v2589_v48 = vld [vmem:[%s2439_s5 + $0x78] sm:$0xff] }
  0x7e   : > { %3514 = vst [vmem:[#allocation37_spill] sm:$0xff] %v2583_v46  ;;  %3515 = vst [vmem:[#allocation38_spill] sm:$0xff] %v2586_v47  ;;  %v2592_v49 = vld [vmem:[%s2439_s5 + $0x80] sm:$0xff]  ;;  %v2595_v50 = vld [vmem:[%s2439_s5 + $0x88] sm:$0xff] }
  0x7f   : > { %3516 = vst [vmem:[#allocation39_spill] sm:$0xff] %v2589_v48  ;;  %v2598_v51 = vld [vmem:[%s2439_s5 + $0x90] sm:$0xff]  ;;  %v2601_v52 = vld [vmem:[%s2439_s5 + $0x98] sm:$0xff]  ;;  %v2604_v53 = vld [vmem:[%s2439_s5 + $0xa0] sm:$0xff]  ;;  %313 = sbr.rel (%p1541_p8) target bundleno = 222 (0xde), region = 44 }
  0x80   : > { %v2607_v54 = vld [vmem:[%s2439_s5 + $0xa8] sm:$0xff]  ;;  %v2610_v55 = vld [vmem:[%s2439_s5 + $0xb0] sm:$0xff]  ;;  %v2613_v56 = vld [vmem:[%s2439_s5 + $0xb8] sm:$0xff] }
  0x81   : > { %v2616_v57 = vld [vmem:[%s2439_s5 + $0xc0] sm:$0xff]  ;;  %v2619_v58 = vld [vmem:[%s2439_s5 + $0xc8] sm:$0xff]  ;;  %v2622_v59 = vld [vmem:[%s2439_s5 + $0xd0] sm:$0xff] }
  0x82   : > { %3517 = vst [vmem:[#allocation40_spill] sm:$0xff] %v2616_v57  ;;  %3518 = vst [vmem:[#allocation41_spill] sm:$0xff] %v2619_v58  ;;  %v2625_v60 = vld [vmem:[%s2439_s5 + $0xd8] sm:$0xff]  ;;  %v2628_v61 = vld [vmem:[%s2439_s5 + $0xe0] sm:$0xff]  ;;  %v358_v58 = vmul.f32 (!%p1541_p8), %v2457_v4, %v2457_v4 }
  0x83   : > { %3519 = vst [vmem:[#allocation42_spill] sm:$0xff] %v2622_v59  ;;  %3520 = vst [vmem:[#allocation43_spill] sm:$0xff] %v2625_v60  ;;  %v2631_v62 = vld [vmem:[%s2439_s5 + $0xe8] sm:$0xff]  ;;  %v2634_v63 = vld [vmem:[%s2439_s5 + $0xf0] sm:$0xff]  ;;  %v317_v59 = vadd.f32 (!%p1541_p8), %v316_v31, %v2457_v4  ;;  %v355_v60 = vmul.f32 (!%p1541_p8), %v2448_v1, %v2448_v1  ;;  %v427_v31 = vadd.f32 (!%p1541_p8), %v2547_v34, %v2544_v33 }
  0x84   : > { %3521 = vst [vmem:[#allocation44_spill] sm:$0xff] %v2628_v61  ;;  %3522 = vst [vmem:[#allocation45_spill] sm:$0xff] %v2631_v62  ;;  %v2637_v0 = vld [vmem:[%s2439_s5 + $0xf8] sm:$0xff]  ;;  %v356_v62 = vmul.f32 (!%p1541_p8), %v2451_v2, %v2451_v2  ;;  %v359_v1 = vmul.f32 (!%p1541_p8), %v2460_v5, %v2460_v5 }
  0x85   : > { %3523 = vst [vmem:[#allocation46_spill] sm:$0xff] %v2634_v63  ;;  %3524 = vst [vmem:[#allocation47_spill] sm:$0xff] %v2637_v0  ;;  %v318_v63 = vadd.f32 (!%p1541_p8), %v317_v59, %v2460_v5  ;;  %v357_v0 = vmul.f32 (!%p1541_p8), %v2454_v3, %v2454_v3  ;;  %v428_v59 = vadd.f32 (!%p1541_p8), %v427_v31, %v2550_v35 }
  0x86   : > { %v387_v30 = vadd.f32 %v356_v62, %v355_v60  ;;  %v361_v62 = vmul.f32 %v2466_v7, %v2466_v7 }
  0x87   : > { %v319_v61 = vadd.f32 %v318_v63, %v2463_v6  ;;  %v360_v63 = vmul.f32 %v2463_v6, %v2463_v6  ;;  %v429_v4 = vadd.f32 %v428_v59, %v2553_v36 }
  0x88   : > { %v388_v2 = vadd.f32 %v387_v30, %v357_v0  ;;  %v362_v0 = vmul.f32 %v2469_v8, %v2469_v8 }
  0x89   : > { %v320_v32 = vadd.f32 %v319_v61, %v2466_v7  ;;  %v430_v29 = vadd.f32 %v429_v4, %v2556_v37 }
  0x8a   : > { %v389_v3 = vadd.f32 %v388_v2, %v358_v58  ;;  %v467_v58 = vmul.f32 %v2544_v33, %v2544_v33 }
  0x8b   : > { %v321_v57 = vadd.f32 %v320_v32, %v2469_v8  ;;  %v431_v32 = vadd.f32 %v430_v29, %v2559_v38  ;;  %v364_v29 = vmul.f32 %v2475_v10, %v2475_v10  ;;  %v470_v8 = vmul.f32 %v2553_v36, %v2553_v36 }
  0x8c   : > { %v390_v61 = vadd.f32 %v389_v3, %v359_v1  ;;  %v363_v1 = vmul.f32 %v2472_v9, %v2472_v9 }
  0x8d   : > { %v322_v60 = vadd.f32 %v321_v57, %v2472_v9  ;;  %v468_v57 = vmul.f32 %v2547_v34, %v2547_v34  ;;  %v432_v4 = vadd.f32 %v431_v32, %v2562_v39 }
  0x8e   : > { %v391_v31 = vadd.f32 %v390_v61, %v360_v63  ;;  %v469_v63 = vmul.f32 %v2550_v35, %v2550_v35 }
  0x8f   : > { %v323_v30 = vadd.f32 %v322_v60, %v2475_v10  ;;  %v433_v61 = vadd.f32 %v432_v4, %v2565_v40  ;;  %v499_v9 = vadd.f32 %v468_v57, %v467_v58  ;;  %v471_v10 = vmul.f32 %v2556_v37, %v2556_v37 }
  0x90   : > { %v392_v3 = vadd.f32 %v391_v31, %v361_v62  ;;  %v365_v62 = vmul.f32 %v2478_v11, %v2478_v11  ;;  %v472_v57 = vmul.f32 %v2559_v38, %v2559_v38 }
  0x91   : > { %v324_v2 = vadd.f32 %v323_v30, %v2478_v11  ;;  %v434_v32 = vadd.f32 %v433_v61, %v2568_v41 }
  0x92   : > { %v393_v60 = vadd.f32 %v392_v3, %v362_v0  ;;  %v500_v0 = vadd.f32 %v499_v9, %v469_v63  ;;  %v366_v3 = vmul.f32 %v2481_v12, %v2481_v12  ;;  %v473_v63 = vmul.f32 %v2562_v39, %v2562_v39 }
  0x93   : > { %v325_v59 = vadd.f32 %v324_v2, %v2481_v12 }
  0x94   : > { %v394_v31 = vadd.f32 %v393_v60, %v363_v1  ;;  %v501_v1 = vadd.f32 %v500_v0, %v470_v8  ;;  %v367_v60 = vmul.f32 %v2484_v13, %v2484_v13  ;;  %v474_v0 = vmul.f32 %v2565_v40, %v2565_v40 }
  0x95   : > { %v326_v30 = vadd.f32 %v325_v59, %v2484_v13  ;;  %v435_v59 = vadd.f32 %v434_v32, %v2571_v42 }
  0x96   : > { %v395_v4 = vadd.f32 %v394_v31, %v364_v29  ;;  %v502_v29 = vadd.f32 %v501_v1, %v471_v10  ;;  %v368_v31 = vmul.f32 %v2487_v14, %v2487_v14  ;;  %v475_v1 = vmul.f32 %v2568_v41, %v2568_v41 }
  0x97   : > { %v327_v2 = vadd.f32 %v326_v30, %v2487_v14  ;;  %v436_v30 = vadd.f32 %v435_v59, %v2574_v43 }
  0x98   : > { %v396_v61 = vadd.f32 %v395_v4, %v365_v62  ;;  %v503_v62 = vadd.f32 %v502_v29, %v472_v57  ;;  %v369_v4 = vmul.f32 %v2490_v15, %v2490_v15  ;;  %v476_v29 = vmul.f32 %v2571_v42, %v2571_v42 }
  0x99   : > { %v328_v58 = vadd.f32 %v327_v2, %v2490_v15  ;;  %v437_v2 = vadd.f32 %v436_v30, %v2577_v44 }
  0x9a   : > { %v397_v32 = vadd.f32 %v396_v61, %v366_v3  ;;  %v504_v3 = vadd.f32 %v503_v62, %v473_v63  ;;  %v370_v61 = vmul.f32 %v2493_v16, %v2493_v16  ;;  %v477_v62 = vmul.f32 %v2574_v43, %v2574_v43 }
  0x9b   : > { %v329_v9 = vadd.f32 %v328_v58, %v2493_v16  ;;  %v438_v58 = vadd.f32 %v437_v2, %v2580_v45 }
  0x9c   : > { %v398_v59 = vadd.f32 %v397_v32, %v367_v60  ;;  %v505_v60 = vadd.f32 %v504_v3, %v474_v0  ;;  %v371_v32 = vmul.f32 %v2496_v17, %v2496_v17  ;;  %v478_v3 = vmul.f32 %v2577_v44, %v2577_v44 }
  0x9d   : > { %v330_v8 = vadd.f32 %v329_v9, %v2496_v17  ;;  %v439_v9 = vadd.f32 %v438_v58, %v2583_v46 }
  0x9e   : > { %v399_v30 = vadd.f32 %v398_v59, %v368_v31  ;;  %v506_v31 = vadd.f32 %v505_v60, %v475_v1  ;;  %v372_v59 = vmul.f32 %v2499_v18, %v2499_v18  ;;  %v479_v60 = vmul.f32 %v2580_v45, %v2580_v45  ;;  %v3531_v45 = vld [vmem:[#allocation34_spill] sm:$0xff] }
  0x9f   : > { %v331_v10 = vadd.f32 %v330_v8, %v2499_v18  ;;  %v440_v8 = vadd.f32 %v439_v9, %v2586_v47 }
  0xa0   : > { %v400_v2 = vadd.f32 %v399_v30, %v369_v4  ;;  %v507_v4 = vadd.f32 %v506_v31, %v476_v29  ;;  %v373_v30 = vmul.f32 %v2502_v19, %v2502_v19  ;;  %v480_v31 = vmul.f32 %v2583_v46, %v2583_v46  ;;  %v3529_v46 = vld [vmem:[#allocation33_spill] sm:$0xff] }
  0xa1   : > { %v332_v57 = vadd.f32 %v331_v10, %v2502_v19  ;;  %v441_v10 = vadd.f32 %v440_v8, %v2589_v48 }
  0xa2   : > { %v401_v58 = vadd.f32 %v400_v2, %v370_v61  ;;  %v508_v61 = vadd.f32 %v507_v4, %v477_v62  ;;  %v374_v2 = vmul.f32 %v2505_v20, %v2505_v20  ;;  %v481_v4 = vmul.f32 %v2586_v47, %v2586_v47  ;;  %v3527_v47 = vld [vmem:[#allocation32_spill] sm:$0xff] }
  0xa3   : > { %v333_v63 = vadd.f32 %v332_v57, %v2505_v20  ;;  %v442_v57 = vadd.f32 %v441_v10, %v2592_v49 }
  0xa4   : > { %v402_v9 = vadd.f32 %v401_v58, %v371_v32  ;;  %v509_v32 = vadd.f32 %v508_v61, %v478_v3  ;;  %v375_v58 = vmul.f32 %v2508_v21, %v2508_v21  ;;  %v482_v61 = vmul.f32 %v2589_v48, %v2589_v48  ;;  %v3525_v48 = vld [vmem:[#allocation31_spill] sm:$0xff] }
  0xa5   : > { %v334_v0 = vadd.f32 %v333_v63, %v2508_v21  ;;  %v443_v63 = vadd.f32 %v442_v57, %v2595_v50 }
  0xa6   : > { %v403_v8 = vadd.f32 %v402_v9, %v372_v59  ;;  %v510_v59 = vadd.f32 %v509_v32, %v479_v60  ;;  %v376_v9 = vmul.f32 %v2511_v22, %v2511_v22  ;;  %v483_v32 = vmul.f32 %v2592_v49, %v2592_v49 }
  0xa7   : > { %v335_v1 = vadd.f32 %v334_v0, %v2511_v22  ;;  %v444_v0 = vadd.f32 %v443_v63, %v2598_v51 }
  0xa8   : > { %v404_v10 = vadd.f32 %v403_v8, %v373_v30  ;;  %v511_v30 = vadd.f32 %v510_v59, %v480_v31  ;;  %v377_v8 = vmul.f32 %v2514_v23, %v2514_v23  ;;  %v484_v59 = vmul.f32 %v2595_v50, %v2595_v50 }
  0xa9   : > { %v336_v29 = vadd.f32 %v335_v1, %v2514_v23  ;;  %v445_v1 = vadd.f32 %v444_v0, %v2601_v52 }
  0xaa   : > { %v405_v57 = vadd.f32 %v404_v10, %v374_v2  ;;  %v512_v2 = vadd.f32 %v511_v30, %v481_v4  ;;  %v378_v10 = vmul.f32 %v2517_v24, %v2517_v24  ;;  %v485_v30 = vmul.f32 %v2598_v51, %v2598_v51 }
  0xab   : > { %v337_v62 = vadd.f32 %v336_v29, %v2517_v24  ;;  %v446_v29 = vadd.f32 %v445_v1, %v2604_v53 }
  0xac   : > { %v406_v63 = vadd.f32 %v405_v57, %v375_v58  ;;  %v513_v58 = vadd.f32 %v512_v2, %v482_v61  ;;  %v379_v57 = vmul.f32 %v2520_v25, %v2520_v25  ;;  %v486_v2 = vmul.f32 %v2601_v52, %v2601_v52 }
  0xad   : > { %v338_v3 = vadd.f32 %v337_v62, %v2520_v25  ;;  %v447_v62 = vadd.f32 %v446_v29, %v2607_v54 }
  0xae   : > { %v407_v0 = vadd.f32 %v406_v63, %v376_v9  ;;  %v514_v9 = vadd.f32 %v513_v58, %v483_v32  ;;  %v380_v63 = vmul.f32 %v2523_v26, %v2523_v26  ;;  %v487_v58 = vmul.f32 %v2604_v53, %v2604_v53 }
  0xaf   : > { %v339_v60 = vadd.f32 %v338_v3, %v2523_v26  ;;  %v448_v3 = vadd.f32 %v447_v62, %v2610_v55 }
  0xb0   : > { %v408_v1 = vadd.f32 %v407_v0, %v377_v8  ;;  %v515_v8 = vadd.f32 %v514_v9, %v484_v59  ;;  %v381_v0 = vmul.f32 %v2526_v27, %v2526_v27  ;;  %v488_v9 = vmul.f32 %v2607_v54, %v2607_v54 }
  0xb1   : > { %v340_v31 = vadd.f32 %v339_v60, %v2526_v27  ;;  %v449_v60 = vadd.f32 %v448_v3, %v2613_v56 }
  0xb2   : > { %v409_v29 = vadd.f32 %v408_v1, %v378_v10  ;;  %v516_v10 = vadd.f32 %v515_v8, %v485_v30  ;;  %v382_v1 = vmul.f32 %v2529_v28, %v2529_v28  ;;  %v489_v8 = vmul.f32 %v2610_v55, %v2610_v55 }
  0xb3   : > { %v341_v4 = vadd.f32 %v340_v31, %v2529_v28  ;;  %v3526_v31 = vld [vmem:[#allocation40_spill] sm:$0xff] }
  0xb4   : > { %v410_v62 = vadd.f32 %v409_v29, %v379_v57  ;;  %v450_v16 = vadd.f32 %v449_v60, %v3526_v31  ;;  %v517_v57 = vadd.f32 %v516_v10, %v486_v2  ;;  %v383_v29 = vmul.f32 %v3525_v48, %v3525_v48  ;;  %v3533_v10 = vld [vmem:[#allocation44_spill] sm:$0xff] }
  0xb5   : > { %v342_v61 = vadd.f32 %v341_v4, %v3525_v48  ;;  %v3528_v4 = vld [vmem:[#allocation41_spill] sm:$0xff]  ;;  %v490_v2 = vmul.f32 %v2613_v56, %v2613_v56 }
  0xb6   : > { %v411_v3 = vadd.f32 %v410_v62, %v380_v63  ;;  %v451_v15 = vadd.f32 %v450_v16, %v3528_v4  ;;  %v518_v63 = vadd.f32 %v517_v57, %v487_v58  ;;  %v384_v16 = vmul.f32 %v3527_v47, %v3527_v47 }
  0xb7   : > { %v343_v32 = vadd.f32 %v342_v61, %v3527_v47  ;;  %v3530_v61 = vld [vmem:[#allocation42_spill] sm:$0xff]  ;;  %v491_v58 = vmul.f32 %v3526_v31, %v3526_v31  ;;  %v386_v47 = vmul.f32 %v3531_v45, %v3531_v45 }
  0xb8   : > { %v412_v60 = vadd.f32 %v411_v3, %v381_v0  ;;  %v452_v14 = vadd.f32 %v451_v15, %v3530_v61  ;;  %v519_v48 = vadd.f32 %v518_v63, %v488_v9  ;;  %v385_v15 = vmul.f32 %v3529_v46, %v3529_v46 }
  0xb9   : > { %v344_v59 = vadd.f32 %v343_v32, %v3529_v46  ;;  %v3532_v32 = vld [vmem:[#allocation43_spill] sm:$0xff]  ;;  %v492_v9 = vmul.f32 %v3528_v4, %v3528_v4 }
  0xba   : > { %v413_v62 = vadd.f32 %v412_v60, %v382_v1  ;;  %v453_v13 = vadd.f32 %v452_v14, %v3532_v32  ;;  %v520_v57 = vadd.f32 %v519_v48, %v489_v8  ;;  %v3534_v1 = vld [vmem:[#allocation45_spill] sm:$0xff]  ;;  %v3536_v8 = vld [vmem:[#allocation47_spill] sm:$0xff] }
  0xbb   : > { %v345_v30 = vadd.f32 %v344_v59, %v3531_v45 }
  0xbc   : > { %v414_v0 = vadd.f32 %v413_v62, %v383_v29  ;;  %v454_v3 = vadd.f32 %v453_v13, %v3533_v10  ;;  %v521_v63 = vadd.f32 %v520_v57, %v490_v2  ;;  %v3535_v29 = vld [vmem:[#allocation46_spill] sm:$0xff] }
  0xbd   : > { %v346_v44 = vrot.slane %v345_v30, 4 }
  0xbe   : > { %v415_v14 = vadd.f32 %v414_v0, %v384_v16  ;;  %v455_v60 = vadd.f32 %v454_v3, %v3534_v1  ;;  %v522_v31 = vadd.f32 %v521_v63, %v491_v58  ;;  %v494_v16 = vmul.f32 %v3532_v32, %v3532_v32  ;;  %v314_v3 = vld [vmem:[#allocation2] sm:$0x1] }
  0xbf   : > { %v347_v59 = vadd.f32 %v346_v44, %v345_v30  ;;  %v493_v44 = vmul.f32 %v3530_v61, %v3530_v61  ;;  %v496_v58 = vmul.f32 %v3534_v1, %v3534_v1  ;;  %v497_v32 = vmul.f32 %v3535_v29, %v3535_v29 }
  0xc0   : > { %v416_v46 = vadd.f32 %v415_v14, %v385_v15  ;;  %v456_v62 = vadd.f32 %v455_v60, %v3535_v29  ;;  %v523_v0 = vadd.f32 %v522_v31, %v492_v9  ;;  %v495_v15 = vmul.f32 %v3533_v10, %v3533_v10  ;;  %v426_v31 = vld [vmem:[#allocation4] sm:$0x1] }
  0xc1   : > { %v348_v12 = vrot.slane %v347_v59, 2  ;;  %v498_v10 = vmul.f32 %v3536_v8, %v3536_v8 }
  0xc2   : > { %v417_v30 = vadd.f32 %v416_v46, %v386_v47  ;;  %v457_v48 = vadd.f32 %v456_v62, %v3536_v8 }
  0xc3   : > { %v349_v13 = vadd.f32 %v348_v12, %v347_v59  ;;  %v524_v12 = vadd.f32 %v523_v0, %v493_v44  ;;  %v354_v44 = vld [vmem:[#allocation3] sm:$0x1] }
  0xc4   : > { %v418_v28 = vrot.slane %v417_v30, 4  ;;  %v458_v4 = vrot.slane %v457_v48, 4 }
  0xc5   : > { %v350_v45 = vrot.slane %v349_v13, 1  ;;  %v525_v47 = vadd.f32 %v524_v12, %v494_v16  ;;  %v466_v12 = vld [vmem:[#allocation5] sm:$0x1] }
  0xc6   : > { %v419_v59 = vadd.f32 %v418_v28, %v417_v30  ;;  %v459_v57 = vadd.f32 %v458_v4, %v457_v48 }
  0xc7   : > { %v351_v2 = vadd.f32 %v350_v45, %v349_v13  ;;  %v526_v9 = vadd.f32 %v525_v47, %v495_v15 }
  0xc8   : > { %v420_v14 = vrot.slane %v419_v59, 2  ;;  %v460_v60 = vrot.slane %v459_v57, 2 }
  0xc9   : > { %v352_v61 = vadd.f32 %v351_v2, %v314_v3  ;;  %v527_v62 = vadd.f32 %v526_v9, %v496_v58 }
  0xca   : > { %v421_v63 = vadd.f32 %v420_v14, %v419_v59  ;;  %v461_v46 = vadd.f32 %v460_v60, %v459_v57 }
  0xcb   : > { %353 = vst [vmem:[#allocation2] sm:$0x1] %v352_v61  ;;  %v528_v30 = vadd.f32 %v527_v62, %v497_v32 }
  0xcc   : > { %v422_v28 = vrot.slane %v421_v63, 1  ;;  %v462_v13 = vrot.slane %v461_v46, 1 }
  0xcd   : > { %v529_v45 = vadd.f32 %v528_v30, %v498_v10 }
  0xce   : > { %v423_v1 = vadd.f32 %v422_v28, %v421_v63  ;;  %v463_v48 = vadd.f32 %v462_v13, %v461_v46 }
  0xcf   : > { %v530_v3 = vrot.slane %v529_v45, 4 }
  0xd0   : > { %v424_v16 = vadd.f32 %v423_v1, %v354_v44  ;;  %v464_v0 = vadd.f32 %v463_v48, %v426_v31 }
  0xd1   : > { %v531_v29 = vadd.f32 %v530_v3, %v529_v45 }
  0xd2   : > { %425 = vst [vmem:[#allocation3] sm:$0x1] %v424_v16  ;;  %465 = vst [vmem:[#allocation4] sm:$0x1] %v464_v0 }
  0xd3   : > { %v532_v4 = vrot.slane %v531_v29, 2 }
  0xd5   : > { %v533_v2 = vadd.f32 %v532_v4, %v531_v29 }
  0xd7   : > { %v534_v15 = vrot.slane %v533_v2, 1 }
  0xd9   : > { %v535_v8 = vadd.f32 %v534_v15, %v533_v2 }
  0xdb   : > { %v536_v59 = vadd.f32 %v535_v8, %v466_v12 }
  0xdd   : > { %537 = vst [vmem:[#allocation5] sm:$0x1] %v536_v59 }
  0xde PF: > { %p538_p2 = scmp.eq.s32.totalorder %s2229_s13, 1  ;;  %p1542_p3 = scmp.ne.s32.totalorder %s2229_s13, 1 }
  0xe0   : > { %541 = sbr.rel (%p1542_p3) target bundleno = 672 (0x2a0), region = 48 }
  0xe7   : > { %v542_v57 = vld [vmem:[#allocation2] sm:$0x1]  ;;  %v544_v61 = vld [vmem:[#allocation4] sm:$0x1]  ;;  %v561_v32 = vlaneseq  ;;  %v546_v9 = vld [vmem:[#allocation3] sm:$0x1] }
  0xe8   : > { %v543_v58 = vmul.f32 0.001953125, %v542_v57  ;;  %v545_v47 = vmul.f32 0.001953125, %v544_v61  ;;  %v551_v63 = vld [vmem:[#allocation5] sm:$0x1]  ;;  %v3537_v29 = vld [vmem:[#allocation18_spill] sm:$0xff]  ;;  %v3538_v8 = vld [vmem:[#allocation19_spill] sm:$0xff] }
  0xe9   : > { %v562_v13 = vshrl.u32 %v561_v32, 7 }
  0xea   : > { %v547_v14 = vmul.f32 512.0, %v543_v58  ;;  %v552_v60 = vmul.f32 512.0, %v545_v47 }
  0xeb   : > { %v563_v48 = vsub.s32 0, %v562_v13 }
  0xec   : > { %v548_v46 = vmul.f32 %v547_v14, %v543_v58  ;;  %v553_v10 = vmul.f32 %v552_v60, %v545_v47 }
  0xed   : > { %v2834_v45 = vrot.slane %v543_v58, %v563_v48  ;;  %v2836_v16 = vrot.slane %v545_v47, %v563_v48 }
  0xee   : > { %v549_v62 = vsub.f32 %v546_v9, %v548_v46  ;;  %v554_v28 = vsub.f32 %v551_v63, %v553_v10 }
  0xef   : > { %v582_v0 = vsub.f32 %v2496_v17, %v2834_v45  ;;  %v658_v3 = vsub.f32 %v2592_v49, %v2836_v16  ;;  %v566_v4 = vsub.f32 %v3537_v29, %v2834_v45  ;;  %v642_v2 = vsub.f32 %v2544_v33, %v2836_v16  ;;  %v3539_v33 = vld [vmem:[#allocation20_spill] sm:$0xff] }
  0xf0   : > { %v550_v44 = vmul.f32 0.0019569471, %v549_v62  ;;  %v555_v31 = vmul.f32 0.0019569471, %v554_v28  ;;  %v583_v15 = vsub.f32 %v2499_v18, %v2834_v45  ;;  %v659_v12 = vsub.f32 %v2595_v50, %v2836_v16 }
  0xf1   : > { %v567_v59 = vsub.f32 %v3538_v8, %v2834_v45  ;;  %v643_v17 = vsub.f32 %v2547_v34, %v2836_v16  ;;  %v584_v49 = vsub.f32 %v2502_v19, %v2834_v45  ;;  %v660_v57 = vsub.f32 %v2598_v51, %v2836_v16  ;;  %v3540_v34 = vld [vmem:[#allocation21_spill] sm:$0xff] }
  0xf2   : > { %v556_v30 = vmul.f32 128.0, %v550_v44  ;;  %v558_v1 = vmul.f32 128.0, %v555_v31  ;;  %v568_v61 = vsub.f32 %v3539_v33, %v2834_v45  ;;  %v644_v18 = vsub.f32 %v2550_v35, %v2836_v16 }
  0xf3   : > { %v585_v50 = vsub.f32 %v2505_v20, %v2834_v45  ;;  %v661_v58 = vsub.f32 %v2601_v52, %v2836_v16  ;;  %v569_v14 = vsub.f32 %v3540_v34, %v2834_v45  ;;  %v645_v19 = vsub.f32 %v2553_v36, %v2836_v16 }
  0xf4   : > { %2091 = vrsqrt.f32 %v556_v30  ;;  %v586_v51 = vsub.f32 %v2508_v21, %v2834_v45  ;;  %v662_v60 = vsub.f32 %v2604_v53, %v2836_v16  ;;  %v570_v20 = vsub.f32 %v2460_v5, %v2834_v45 }
  0xf5   : > { %2093 = vrsqrt.f32 %v558_v1  ;;  %v646_v52 = vsub.f32 %v2556_v37, %v2836_v16  ;;  %v587_v9 = vsub.f32 %v2511_v22, %v2834_v45  ;;  %v663_v21 = vsub.f32 %v2607_v54, %v2836_v16 }
  0xf6   : > { %v571_v36 = vsub.f32 %v2463_v6, %v2834_v45  ;;  %v647_v53 = vsub.f32 %v2559_v38, %v2836_v16  ;;  %v588_v13 = vsub.f32 %v2514_v23, %v2834_v45  ;;  %v664_v44 = vsub.f32 %v2610_v55, %v2836_v16  ;;  %v3559_v55 = vld [vmem:[#allocation35_spill] sm:$0xff] }
  0xf7   : > { %v572_v31 = vsub.f32 %v2466_v7, %v2834_v45  ;;  %v648_v30 = vsub.f32 %v2562_v39, %v2836_v16 }
  0xfe   : > { %v2092_v47 = vpop.eup %2091 }
  0xff   : > { %v2094_v35 = vpop.eup %2093  ;;  %v2874_v32 = vrot.slane %v2092_v47, %v563_v48  ;;  %v3554_v47 = vld [vmem:[#allocation30_spill] sm:$0xff] }
 0x100   : > { %v2882_v63 = vrot.slane %v2094_v35, %v563_v48 }
 0x101   : > { %v2891_v46 = vmul.f32 %v2874_v32, %v582_v0  ;;  %v2894_v5 = vmul.f32 %v2874_v32, %v566_v4  ;;  %v2897_v37 = vmul.f32 %v2874_v32, %v583_v15  ;;  %v2900_v10 = vmul.f32 %v2874_v32, %v567_v59 }
 0x102   : > { %v2903_v62 = vmul.f32 %v2882_v63, %v658_v3  ;;  %v2906_v6 = vmul.f32 %v2882_v63, %v642_v2  ;;  %v2909_v38 = vmul.f32 %v2882_v63, %v659_v12  ;;  %v2912_v28 = vmul.f32 %v2882_v63, %v643_v17 }
 0x103   : > { %v2929_v3 = vmul.f32 %v2874_v32, %v584_v49  ;;  %v2934_v7 = vmul.f32 %v2882_v63, %v660_v57  ;;  %v2937_v39 = vmul.f32 %v2874_v32, %v568_v61  ;;  %v2940_v4 = vmul.f32 %v2882_v63, %v644_v18  ;;  %v3541_v49 = vld [vmem:[#allocation22_spill] sm:$0xff] }
 0x104   : > { %v1867_v1 = vpack.i.bf16 %v2903_v62, %v2891_v46  ;;  %v1979_v48 = vpack.i.bf16 %v2906_v6, %v2894_v5  ;;  %v1227_v0 = vmul.f32 %v2906_v6, %v2894_v5  ;;  %v1228_v29 = vmul.f32 %v2912_v28, %v2900_v10 }
 0x105   : > { %v1869_v2 = vpack.i.bf16 %v2909_v38, %v2897_v37  ;;  %v1981_v15 = vpack.i.bf16 %v2912_v28, %v2900_v10  ;;  %v589_v12 = vsub.f32 %v2517_v24, %v2834_v45  ;;  %v1229_v59 = vmul.f32 %v2940_v4, %v2937_v39 }
 0x106   : > { %1868 = vxpose.xlu0.b32.start [1/16] %v1867_v1, 128  ;;  %1980 = vxpose.xlu1.b32.start [1/16] %v1979_v48, 128  ;;  %v1259_v8 = vadd.f32 %v1228_v29, %v1227_v0  ;;  %v573_v57 = vsub.f32 %v3541_v49, %v2834_v45  ;;  %v2955_v33 = vmul.f32 %v2874_v32, %v569_v14  ;;  %v3542_v48 = vld [vmem:[#allocation40_spill] sm:$0xff] }
 0x107   : > { %v2958_v61 = vmul.f32 %v2882_v63, %v645_v19  ;;  %v649_v18 = vsub.f32 %v2565_v40, %v2836_v16  ;;  %v1871_v34 = vpack.i.bf16 %v2934_v7, %v2929_v3  ;;  %v1983_v35 = vpack.i.bf16 %v2940_v4, %v2937_v39 }
 0x108   : > { %v1260_v1 = vadd.f32 %v1259_v8, %v1229_v59  ;;  %v2971_v19 = vmul.f32 %v2874_v32, %v585_v50  ;;  %v2974_v40 = vmul.f32 %v2882_v63, %v661_v58  ;;  %v2979_v29 = vmul.f32 %v2874_v32, %v570_v20  ;;  %v3544_v8 = vld [vmem:[#allocation23_spill] sm:$0xff] }
 0x109   : > { %v1230_v0 = vmul.f32 %v2958_v61, %v2955_v33  ;;  %v2982_v49 = vmul.f32 %v2882_v63, %v646_v52  ;;  %v574_v59 = vsub.f32 %v3544_v8, %v2834_v45  ;;  %v2992_v58 = vmul.f32 %v2882_v63, %v647_v53 }
 0x10a   : > { %1870 = vxpose.xlu0.b32.cont [2/16] %v1869_v2, 128  ;;  %1982 = vxpose.xlu1.b32.cont [2/16] %v1981_v15, 128  ;;  %v650_v2 = vsub.f32 %v2568_v41, %v2836_v16  ;;  %v2989_v15 = vmul.f32 %v2874_v32, %v571_v36  ;;  %v2997_v14 = vmul.f32 %v2874_v32, %v586_v51  ;;  %v3547_v41 = vld [vmem:[#allocation41_spill] sm:$0xff] }
 0x10b   : > { %3543 = vst [vmem:[#allocation48_spill] sm:$0xff] %v2982_v49  ;;  %v1261_v50 = vadd.f32 %v1260_v1, %v1230_v0  ;;  %3546 = vst [vmem:[#allocation50_spill] sm:$0xff] %v2992_v58  ;;  %v3000_v52 = vmul.f32 %v2882_v63, %v662_v60  ;;  %v1231_v8 = vmul.f32 %v2982_v49, %v2979_v29  ;;  %v3550_v1 = vld [vmem:[#allocation24_spill] sm:$0xff] }
 0x10c   : > { %3545 = vst [vmem:[#allocation49_spill] sm:$0xff] %v2989_v15  ;;  %v1873_v36 = vpack.i.bf16 %v2974_v40, %v2971_v19  ;;  %v1985_v53 = vpack.i.bf16 %v2958_v61, %v2955_v33  ;;  %v1232_v51 = vmul.f32 %v2992_v58, %v2989_v15  ;;  %v3013_v60 = vmul.f32 %v2874_v32, %v572_v31 }
 0x10d   : > { %v1262_v0 = vadd.f32 %v1261_v50, %v1231_v8  ;;  %v3016_v20 = vmul.f32 %v2882_v63, %v648_v30  ;;  %v3030_v50 = vmul.f32 %v2882_v63, %v663_v21  ;;  %v651_v31 = vsub.f32 %v2571_v42, %v2836_v16  ;;  %v3553_v21 = vld [vmem:[#allocation42_spill] sm:$0xff] }
 0x10e   : > { %1872 = vxpose.xlu0.b32.cont [3/16] %v1871_v34, 128  ;;  %1984 = vxpose.xlu1.b32.cont [3/16] %v1983_v35, 128  ;;  %3548 = vst [vmem:[#allocation51_spill] sm:$0xff] %v3013_v60  ;;  %v575_v34 = vsub.f32 %v3550_v1, %v2834_v45  ;;  %v3024_v35 = vmul.f32 %v2874_v32, %v587_v9 }
 0x10f   : > { %3549 = vst [vmem:[#allocation52_spill] sm:$0xff] %v3016_v20  ;;  %v1263_v8 = vadd.f32 %v1262_v0, %v1232_v51  ;;  %v1233_v1 = vmul.f32 %v3016_v20, %v3013_v60  ;;  %v3039_v22 = vmul.f32 %v2874_v32, %v573_v57  ;;  %v3042_v9 = vmul.f32 %v2882_v63, %v649_v18 }
 0x110   : > { %v1875_v54 = vpack.i.bf16 %v3000_v52, %v2997_v14  ;;  %v1987_v42 = vpack.i.bf16 %v2982_v49, %v2979_v29  ;;  %v576_v57 = vsub.f32 %v2478_v11, %v2834_v45  ;;  %v652_v18 = vsub.f32 %v2574_v43, %v2836_v16 }
 0x111   : > { %3551 = vst [vmem:[#allocation53_spill] sm:$0xff] %v3039_v22  ;;  %3552 = vst [vmem:[#allocation54_spill] sm:$0xff] %v3042_v9  ;;  %v1264_v0 = vadd.f32 %v1263_v8, %v1233_v1  ;;  %v1234_v30 = vmul.f32 %v3042_v9, %v3039_v22  ;;  %v3555_v8 = vld [vmem:[#allocation43_spill] sm:$0xff]  ;;  %v1877_v51 = vpack.i.bf16 %v3030_v50, %v3024_v35 }
 0x112   : > { %1874 = vxpose.xlu0.b32.cont [4/16] %v1873_v36, 128  ;;  %1986 = vxpose.xlu1.b32.cont [4/16] %v1985_v53, 128  ;;  %v3057_v36 = vmul.f32 %v2874_v32, %v574_v59  ;;  %v3060_v53 = vmul.f32 %v2882_v63, %v650_v2  ;;  %v3072_v11 = vmul.f32 %v2874_v32, %v588_v13  ;;  %v3557_v59 = vld [vmem:[#allocation25_spill] sm:$0xff] }
 0x113   : > { %v1265_v43 = vadd.f32 %v1264_v0, %v1234_v30  ;;  %v577_v2 = vsub.f32 %v3557_v59, %v2834_v45  ;;  %v1989_v17 = vpack.i.bf16 %v2992_v58, %v2989_v15  ;;  %v3082_v1 = vmul.f32 %v2882_v63, %v664_v44 }
 0x114   : > { %3556 = vst [vmem:[#allocation55_spill] sm:$0xff] %v3072_v11  ;;  %v1235_v23 = vmul.f32 %v3060_v53, %v3057_v36  ;;  %v3090_v13 = vmul.f32 %v2874_v32, %v589_v12  ;;  %v3093_v30 = vmul.f32 %v2874_v32, %v575_v34  ;;  %v3560_v44 = vsub.f32 %v2613_v56, %v2836_v16  ;;  %v3563_v56 = vld [vmem:[#allocation36_spill] sm:$0xff] }
 0x115   : > { %3558 = vst [vmem:[#allocation56_spill] sm:$0xff] %v3082_v1  ;;  %v3107_v24 = vmul.f32 %v2874_v32, %v576_v57  ;;  %v3110_v12 = vmul.f32 %v2882_v63, %v652_v18  ;;  %v1879_v57 = vpack.i.bf16 %v3082_v1, %v3072_v11  ;;  %v1991_v18 = vpack.i.bf16 %v3016_v20, %v3013_v60  ;;  %v3566_v20 = vld [vmem:[#allocation27_spill] sm:$0xff]  ;;  %v3573_v1 = vld [vmem:[#allocation38_spill] sm:$0xff] }
 0x116   : > { %1876 = vxpose.xlu0.b32.cont [5/16] %v1875_v54, 128  ;;  %1988 = vxpose.xlu1.b32.cont [5/16] %v1987_v42, 128  ;;  %v3096_v54 = vmul.f32 %v2882_v63, %v651_v31  ;;  %v653_v42 = vsub.f32 %v3559_v55, %v2836_v16  ;;  %v3104_v0 = vmul.f32 %v2882_v63, %v3560_v44  ;;  %v3561_v31 = vld [vmem:[#allocation31_spill] sm:$0xff]  ;;  %v3562_v55 = vld [vmem:[#allocation26_spill] sm:$0xff] }
 0x117   : > { %v1266_v59 = vadd.f32 %v1265_v43, %v1235_v23  ;;  %v578_v49 = vsub.f32 %v3562_v55, %v2834_v45  ;;  %v654_v44 = vsub.f32 %v3563_v56, %v2836_v16  ;;  %v1237_v43 = vmul.f32 %v3110_v12, %v3107_v24  ;;  %v3564_v56 = vld [vmem:[#allocation44_spill] sm:$0xff] }
 0x118   : > { %v1236_v34 = vmul.f32 %v3096_v54, %v3093_v30  ;;  %v3127_v58 = vmul.f32 %v2874_v32, %v577_v2  ;;  %v3130_v55 = vmul.f32 %v2882_v63, %v653_v42  ;;  %v579_v60 = vsub.f32 %v3566_v20, %v2834_v45 }
 0x119   : > { %v3145_v15 = vmul.f32 %v2874_v32, %v578_v49  ;;  %v1993_v11 = vpack.i.bf16 %v3042_v9, %v3039_v22  ;;  %v3570_v20 = vsub.f32 %v2520_v25, %v2834_v45  ;;  %v656_v9 = vsub.f32 %v3573_v1, %v2836_v16 }
 0x11a   : > { %1878 = vxpose.xlu0.b32.cont [6/16] %v1877_v51, 128  ;;  %1990 = vxpose.xlu1.b32.cont [6/16] %v1989_v17, 128  ;;  %v1267_v23 = vadd.f32 %v1266_v59, %v1236_v34  ;;  %v1881_v17 = vpack.i.bf16 %v3104_v0, %v3090_v13  ;;  %v3567_v59 = vld [vmem:[#allocation37_spill] sm:$0xff]  ;;  %v1238_v42 = vmul.f32 %v3130_v55, %v3127_v58 }
 0x11b   : > { %v655_v34 = vsub.f32 %v3567_v59, %v2836_v16  ;;  %3568 = vst [vmem:[#allocation57_spill] sm:$0xff] %v3145_v15  ;;  %v3148_v51 = vmul.f32 %v2882_v63, %v654_v44  ;;  %v3156_v59 = vmul.f32 %v2874_v32, %v3570_v20  ;;  %v3171_v25 = vmul.f32 %v2874_v32, %v579_v60 }
 0x11c   : > { %v1268_v2 = vadd.f32 %v1267_v23, %v1237_v43  ;;  %v3571_v43 = vsub.f32 %v3542_v48, %v2836_v16  ;;  %v3576_v48 = vld [vmem:[#allocation29_spill] sm:$0xff]  ;;  %v3579_v1 = vsub.f32 %v3547_v41, %v2836_v16  ;;  %v1243_v41 = vmul.f32 %v2903_v62, %v2891_v46 }
 0x11d   : > { %3569 = vst [vmem:[#allocation58_spill] sm:$0xff] %v3148_v51  ;;  %v1239_v44 = vmul.f32 %v3148_v51, %v3145_v15  ;;  %3574 = vst [vmem:[#allocation59_spill] sm:$0xff] %v3171_v25  ;;  %v3174_v20 = vmul.f32 %v2882_v63, %v655_v34  ;;  %v3578_v51 = vsub.f32 %v2523_v26, %v2834_v45  ;;  %v3580_v15 = vld [vmem:[#allocation45_spill] sm:$0xff] }
 0x11e   : > { %1880 = vxpose.xlu0.b32.cont [7/16] %v1879_v57, 128  ;;  %1992 = vxpose.xlu1.b32.cont [7/16] %v1991_v18, 128  ;;  %v3162_v49 = vmul.f32 %v2882_v63, %v3571_v43  ;;  %v1269_v23 = vadd.f32 %v1268_v2, %v1238_v42  ;;  %v3572_v57 = vld [vmem:[#allocation28_spill] sm:$0xff]  ;;  %v581_v43 = vsub.f32 %v3576_v48, %v2834_v45  ;;  %v3577_v2 = vld [vmem:[#allocation39_spill] sm:$0xff] }
 0x11f   : > { %v580_v18 = vsub.f32 %v3572_v57, %v2834_v45  ;;  %3575 = vst [vmem:[#allocation60_spill] sm:$0xff] %v3174_v20  ;;  %v657_v42 = vsub.f32 %v3577_v2, %v2836_v16  ;;  %v3184_v57 = vmul.f32 %v2874_v32, %v3578_v51  ;;  %v3190_v60 = vmul.f32 %v2882_v63, %v3579_v1  ;;  %v3581_v2 = vld [vmem:[#allocation33_spill] sm:$0xff] }
 0x120   : > { %v1270_v34 = vadd.f32 %v1269_v23, %v1239_v44  ;;  %v1883_v48 = vpack.i.bf16 %v3162_v49, %v3156_v59  ;;  %v1995_v26 = vpack.i.bf16 %v3060_v53, %v3057_v36  ;;  %v1240_v51 = vmul.f32 %v3174_v20, %v3171_v25 }
 0x121   : > { %v3205_v44 = vmul.f32 %v2874_v32, %v580_v18  ;;  %v3211_v1 = vmul.f32 %v2874_v32, %v581_v43  ;;  %v3214_v22 = vmul.f32 %v2882_v63, %v657_v42  ;;  %v1711_v20 = vpack.c.bf16 %v2897_v37, %v2891_v46 }
 0x122   : > { %1882 = vxpose.xlu0.b32.cont [8/16] %v1881_v17, 128  ;;  %1994 = vxpose.xlu1.b32.cont [8/16] %v1993_v11, 128  ;;  %v3208_v11 = vmul.f32 %v2882_v63, %v656_v9  ;;  %v1271_v17 = vadd.f32 %v1270_v34, %v1240_v51  ;;  %v1885_v25 = vpack.i.bf16 %v3190_v60, %v3184_v57 }
 0x123   : > { %v3582_v18 = vsub.f32 %v2526_v27, %v2834_v45  ;;  %v3583_v9 = vsub.f32 %v3553_v21, %v2836_v16  ;;  %v1997_v46 = vpack.i.bf16 %v3096_v54, %v3093_v30  ;;  %v1242_v27 = vmul.f32 %v3214_v22, %v3211_v1  ;;  %1712 = vmatprep.subr.bf16.mxu0 %v1711_v20 }
 0x124   : > { %v1241_v42 = vmul.f32 %v3208_v11, %v3205_v44  ;;  %v1743_v34 = vpack.c.bf16 %v2909_v38, %v2903_v62  ;;  %v1713_v21 = vpack.c.bf16 %v2900_v10, %v2894_v5  ;;  %v3584_v62 = vsub.f32 %v3554_v47, %v2834_v45 }
 0x125   : > { %v3224_v23 = vmul.f32 %v2874_v32, %v3582_v18  ;;  %v3230_v43 = vmul.f32 %v2882_v63, %v3583_v9  ;;  %v1745_v18 = vpack.c.bf16 %v2912_v28, %v2906_v6  ;;  %v1245_v9 = vmul.f32 %v2934_v7, %v2929_v3 }
 0x126   : > { %1884 = vxpose.xlu0.b32.cont [9/16] %v1883_v48, 128  ;;  %1996 = vxpose.xlu1.b32.cont [9/16] %v1995_v26, 128  ;;  %v1272_v51 = vadd.f32 %v1271_v17, %v1241_v42  ;;  %v1715_v48 = vpack.c.bf16 %v2971_v19, %v2929_v3  ;;  %v1244_v26 = vmul.f32 %v2909_v38, %v2897_v37  ;;  %v3588_v17 = vld [vmem:[#allocation46_spill] sm:$0xff] }
 0x127   : > { %v3254_v20 = vmul.f32 %v2874_v32, %v3584_v62  ;;  %1744 = vmatprep.subr.bf16.mxu1 %v1743_v34  ;;  %v1747_v5 = vpack.c.bf16 %v2974_v40, %v2934_v7  ;;  %1714 = vmatpush3.bf16.msra.mxu0 %v1713_v21  ;;  %v1717_v6 = vpack.c.bf16 %v2955_v33, %v2937_v39 }
 0x128   : > { %v1273_v10 = vadd.f32 %v1272_v51, %v1242_v27  ;;  %1746 = vmatpush3.bf16.msra.mxu1 %v1745_v18  ;;  %v1749_v37 = vpack.c.bf16 %v2958_v61, %v2940_v4  ;;  %v1887_v38 = vpack.i.bf16 %v3230_v43, %v3224_v23  ;;  %v1999_v28 = vpack.i.bf16 %v3110_v12, %v3107_v24  ;;  %v3590_v27 = vld [vmem:[#allocation48_spill] sm:$0xff] }
 0x129   : > { %v3585_v3 = vsub.f32 %v3555_v8, %v2836_v16  ;;  %1716 = vmatprep.subr.bf16.mxu0 %v1715_v48  ;;  %1748 = vmatprep.subr.bf16.mxu1 %v1747_v5  ;;  %v1719_v39 = vpack.c.bf16 %v3024_v35, %v2997_v14  ;;  %v1751_v4 = vpack.c.bf16 %v3030_v50, %v3000_v52  ;;  %v3592_v48 = vld [vmem:[#allocation55_spill] sm:$0xff] }
 0x12a   : > { %1886 = vxpose.xlu0.b32.cont [10/16] %v1885_v25, 128  ;;  %1998 = vxpose.xlu1.b32.cont [10/16] %v1997_v46, 128  ;;  %v1274_v47 = vadd.f32 %v1273_v10, %v1243_v41  ;;  %v1246_v33 = vmul.f32 %v2974_v40, %v2971_v19  ;;  %v3586_v61 = vsub.f32 %v3561_v31, %v2834_v45  ;;  %v3589_v19 = vld [vmem:[#allocation49_spill] sm:$0xff]  ;;  %v3591_v31 = vld [vmem:[#allocation50_spill] sm:$0xff] }
 0x12b   : > { %v3270_v7 = vmul.f32 %v2882_v63, %v3585_v3  ;;  %v3587_v25 = vsub.f32 %v3564_v56, %v2836_v16  ;;  %v672_v42 = vsub.f32 %v3588_v17, %v2836_v16  ;;  %1718 = vmatpush3.bf16.msra.mxu0 %v1717_v6  ;;  %v1721_v40 = vpack.c.bf16 %v3589_v19, %v2979_v29  ;;  %v3594_v10 = vld [vmem:[#allocation34_spill] sm:$0xff]  ;;  %v3597_v3 = vld [vmem:[#allocation52_spill] sm:$0xff] }
 0x12c   : > { %v3282_v8 = vmul.f32 %v2874_v32, %v3586_v61  ;;  %v1275_v46 = vadd.f32 %v1274_v47, %v1244_v26  ;;  %1750 = vmatpush3.bf16.msra.mxu1 %v1749_v37  ;;  %v1753_v34 = vpack.c.bf16 %v3591_v31, %v3590_v27  ;;  %v1247_v51 = vmul.f32 %v3000_v52, %v2997_v14  ;;  %v3593_v26 = vld [vmem:[#allocation56_spill] sm:$0xff]  ;;  %v3595_v37 = vld [vmem:[#allocation51_spill] sm:$0xff]  ;;  %v3598_v47 = vld [vmem:[#allocation54_spill] sm:$0xff] }
 0x12d   : > { %v3288_v41 = vmul.f32 %v2882_v63, %v3587_v25  ;;  %v1889_v56 = vpack.i.bf16 %v3270_v7, %v3254_v20  ;;  %v2001_v21 = vpack.i.bf16 %v3130_v55, %v3127_v58  ;;  %1720 = vmatprep.subr.bf16.mxu0 %v1719_v39  ;;  %1752 = vmatprep.subr.bf16.mxu1 %v1751_v4  ;;  %v3601_v61 = vld [vmem:[#allocation32_spill] sm:$0xff] }
 0x12e   : > { %1888 = vxpose.xlu0.b32.cont [11/16] %v1887_v38, 128  ;;  %2000 = vxpose.xlu1.b32.cont [11/16] %v1999_v28, 128  ;;  %v1276_v18 = vadd.f32 %v1275_v46, %v1245_v9  ;;  %v1723_v29 = vpack.c.bf16 %v3090_v13, %v3592_v48  ;;  %v1755_v62 = vpack.c.bf16 %v3104_v0, %v3593_v26  ;;  %v3596_v38 = vld [vmem:[#allocation53_spill] sm:$0xff] }
 0x12f   : > { %v1248_v14 = vmul.f32 %v3030_v50, %v3024_v35  ;;  %v1249_v52 = vmul.f32 %v3593_v26, %v3592_v48  ;;  %v1891_v5 = vpack.i.bf16 %v3288_v41, %v3282_v8  ;;  %v597_v9 = vsub.f32 %v3594_v10, %v2834_v45  ;;  %1722 = vmatpush3.bf16.msra.mxu0 %v1721_v40  ;;  %v3599_v35 = vld [vmem:[#allocation57_spill] sm:$0xff]  ;;  %v3600_v50 = vld [vmem:[#allocation58_spill] sm:$0xff] }
 0x130   : > { %v1277_v6 = vadd.f32 %v1276_v18, %v1246_v33  ;;  %1754 = vmatpush3.bf16.msra.mxu1 %v1753_v34  ;;  %v1725_v28 = vpack.c.bf16 %v3596_v38, %v3595_v37  ;;  %v1757_v39 = vpack.c.bf16 %v3598_v47, %v3597_v3  ;;  %v2003_v4 = vpack.i.bf16 %v3600_v50, %v3599_v35 }
 0x131   : > { %v3602_v25 = vsub.f32 %v3601_v61, %v2834_v45  ;;  %v3603_v33 = vsub.f32 %v3580_v15, %v2836_v16  ;;  %1724 = vmatprep.subr.bf16.mxu0 %v1723_v29  ;;  %1756 = vmatprep.subr.bf16.mxu1 %v1755_v62  ;;  %v1727_v40 = vpack.c.bf16 %v3184_v57, %v3156_v59  ;;  %v1226_v61 = vld [vmem:[#allocation8] sm:$0x1] }
 0x132   : > { %1890 = vxpose.xlu0.b32.cont [12/16] %v1889_v56, 128  ;;  %2002 = vxpose.xlu1.b32.cont [12/16] %v2001_v21, 128  ;;  %v1278_v19 = vadd.f32 %v1277_v6, %v1247_v51  ;;  %v1759_v27 = vpack.c.bf16 %v3190_v60, %v3162_v49  ;;  %v1250_v31 = vmul.f32 %v3104_v0, %v3090_v13  ;;  %v3605_v51 = vld [vmem:[#allocation47_spill] sm:$0xff] }
 0x133   : > { %v633_v17 = vmul.f32 %v2874_v32, %v3602_v25  ;;  %v709_v46 = vmul.f32 %v2882_v63, %v3603_v33  ;;  %v3604_v34 = vsub.f32 %v3581_v2, %v2834_v45  ;;  %v710_v15 = vmul.f32 %v2882_v63, %v672_v42  ;;  %1726 = vmatpush3.bf16.msra.mxu0 %v1725_v28  ;;  %v3606_v2 = vld [vmem:[#allocation59_spill] sm:$0xff]  ;;  %v3607_v42 = vld [vmem:[#allocation60_spill] sm:$0xff] }
 0x134   : > { %v673_v21 = vsub.f32 %v3605_v51, %v2836_v16  ;;  %v1279_v18 = vadd.f32 %v1278_v19, %v1248_v14  ;;  %1758 = vmatpush3.bf16.msra.mxu1 %v1757_v39  ;;  %v1729_v48 = vpack.c.bf16 %v3093_v30, %v3057_v36  ;;  %v1761_v13 = vpack.c.bf16 %v3096_v54, %v3060_v53 }
 0x135   : > { %v3338_v56 = vmul.f32 %v2874_v32, %v3604_v34  ;;  %v1251_v45 = vmul.f32 %v3162_v49, %v3156_v59  ;;  %v1893_v0 = vpack.i.bf16 %v709_v46, %v633_v17  ;;  %v2005_v29 = vpack.i.bf16 %v3607_v42, %v3606_v2  ;;  %1728 = vmatprep.subr.bf16.mxu0 %v1727_v40 }
 0x136   : > { %1892 = vxpose.xlu0.b32.cont [13/16] %v1891_v5, 128  ;;  %2004 = vxpose.xlu1.b32.cont [13/16] %v2003_v4, 128  ;;  %v1280_v26 = vadd.f32 %v1279_v18, %v1249_v52  ;;  %v1731_v16 = vpack.c.bf16 %v3254_v20, %v3224_v23  ;;  %v1763_v36 = vpack.c.bf16 %v3270_v7, %v3230_v43 }
 0x137   : > { %1760 = vmatprep.subr.bf16.mxu1 %v1759_v27  ;;  %v1252_v53 = vmul.f32 %v3190_v60, %v3184_v57  ;;  %v1253_v30 = vmul.f32 %v3230_v43, %v3224_v23  ;;  %v1895_v54 = vpack.i.bf16 %v710_v15, %v3338_v56  ;;  %1730 = vmatpush3.bf16.msra.mxu0 %v1729_v48 }
 0x138   : > { %v1281_v59 = vadd.f32 %v1280_v26, %v1250_v31  ;;  %1762 = vmatpush3.bf16.msra.mxu1 %v1761_v13  ;;  %v1733_v49 = vpack.c.bf16 %v3127_v58, %v3107_v24  ;;  %v1765_v62 = vpack.c.bf16 %v3130_v55, %v3110_v12  ;;  %v2007_v14 = vpack.i.bf16 %v3208_v11, %v3205_v44 }
 0x139   : > { %v635_v57 = vmul.f32 %v2874_v32, %v597_v9  ;;  %v711_v60 = vmul.f32 %v2882_v63, %v673_v21  ;;  %1732 = vmatprep.subr.bf16.mxu0 %v1731_v16  ;;  %1764 = vmatprep.subr.bf16.mxu1 %v1763_v36  ;;  %v1735_v43 = vpack.c.bf16 %v633_v17, %v3282_v8 }
 0x13a   : > { %1894 = vxpose.xlu0.b32.cont [14/16] %v1893_v0, 128  ;;  %2006 = vxpose.xlu1.b32.cont [14/16] %v2005_v29, 128  ;;  %v1282_v23 = vadd.f32 %v1281_v59, %v1251_v45  ;;  %v1767_v52 = vpack.c.bf16 %v709_v46, %v3288_v41  ;;  %v1254_v58 = vmul.f32 %v3270_v7, %v3254_v20 }
 0x13b   : > { %1734 = vmatpush3.bf16.msra.mxu0 %v1733_v49  ;;  %v1737_v12 = vpack.c.bf16 %v3606_v2, %v3599_v35  ;;  %v1769_v32 = vpack.c.bf16 %v3607_v42, %v3600_v50  ;;  %v1255_v63 = vmul.f32 %v3288_v41, %v3282_v8  ;;  %v1897_v55 = vpack.i.bf16 %v711_v60, %v635_v57 }
 0x13c   : > { %v1283_v24 = vadd.f32 %v1282_v23, %v1252_v53  ;;  %1766 = vmatpush3.bf16.msra.mxu1 %v1765_v62  ;;  %v2009_v5 = vpack.i.bf16 %v3214_v22, %v3211_v1  ;;  %1736 = vmatprep.subr.bf16.mxu0 %v1735_v43  ;;  %v1771_v20 = vpack.c.bf16 %v711_v60, %v710_v15 }
 0x13d   : > { %1768 = vmatprep.subr.bf16.mxu1 %v1767_v52  ;;  %v1739_v7 = vpack.c.bf16 %v635_v57, %v3338_v56  ;;  %v1256_v9 = vmul.f32 %v709_v46, %v633_v17  ;;  %v1773_v37 = vpack.c.bf16 %v3214_v22, %v3208_v11  ;;  %v1741_v8 = vpack.c.bf16 %v3211_v1, %v3205_v44 }
 0x13e   : > { %1896 = vxpose.xlu0.b32.cont [15/16] %v1895_v54, 128  ;;  %2008 = vxpose.xlu1.b32.cont [15/16] %v2007_v14, 128  ;;  %v1284_v10 = vadd.f32 %v1283_v24, %v1253_v30  ;;  %v1257_v41 = vmul.f32 %v710_v15, %v3338_v56  ;;  %v1258_v28 = vmul.f32 %v711_v60, %v635_v57 }
 0x13f   : > { %1738 = vmatpush3.bf16.msra.mxu0 %v1737_v12 }
 0x140   : > { %v1285_v6 = vadd.f32 %v1284_v10, %v1254_v58  ;;  %1770 = vmatpush3.bf16.msra.mxu1 %v1769_v32  ;;  %1740 = vmatprep.subr.bf16.mxu0 %v1739_v7 }
 0x141   : > { %1772 = vmatprep.subr.bf16.mxu1 %v1771_v20 }
 0x142   : > { %1898 = vxpose.xlu0.b32.end [16/16] %v1897_v55, 128  ;;  %2010 = vxpose.xlu1.b32.end [16/16] %v2009_v5, 128  ;;  %v1286_v38 = vadd.f32 %v1285_v6, %v1255_v63 }
 0x143   : > { %1742 = vmatpush3.bf16.msra.mxu0 %v1741_v8 }
 0x144   : > { %v1287_v3 = vadd.f32 %v1286_v38, %v1256_v9  ;;  %1774 = vmatpush3.bf16.msra.mxu1 %v1773_v37 }
 0x146   : > { %v1288_v47 = vadd.f32 %v1287_v3, %v1257_v41 }
 0x148   : > { %v1289_v39 = vadd.f32 %v1288_v47, %v1258_v28 }
 0x14a   : > { %v1290_v35 = vrot.slane %v1289_v39, 4 }
 0x14c   : > { %v1291_v50 = vadd.f32 %v1290_v35, %v1289_v39 }
 0x14e   : > { %v1292_v4 = vrot.slane %v1291_v50, 2 }
 0x150   : > { %v1293_v22 = vadd.f32 %v1292_v4, %v1291_v50 }
 0x152   : > { %v1294_v11 = vrot.slane %v1293_v22, 1 }
 0x154   : > { %v1295_v44 = vadd.f32 %v1294_v11, %v1293_v22 }
 0x156   : > { %v1296_v1 = vadd.f32 %v1295_v44, %v1226_v61 }
 0x158   : > { %1297 = vst [vmem:[#allocation8] sm:$0x1] %v1296_v1 }
 0x186   : > { %v1899_v25 = vpop.trf.xlu0  ;;  %v2011_v17 = vpop.trf.xlu1 }
 0x187   : > { %v1900_v33 = vunpack.i.l.bf16 %v1899_v25  ;;  %v1903_v46 = vunpack.i.h.bf16 %v1899_v25  ;;  %v2012_v19 = vunpack.i.l.bf16 %v2011_v17  ;;  %v2015_v40 = vunpack.i.h.bf16 %v2011_v17 }
 0x189   : > { %856 = vmatprep.mubr.f32.mxu0 %v1900_v33  ;;  %1113 = vmatprep.mubr.f32.mxu1 %v1903_v46 }
 0x18a   : > { %v1904_v27 = vpop.trf.xlu0  ;;  %v2016_v31 = vpop.trf.xlu1  ;;  %857 = vmatmul.mubr.f32.vlgmr.msra.gmra.mrb[0].mxu0 %v2012_v19  ;;  %1114 = vmatmul.mubr.f32.vlgmr.msra.gmra.mrb[0].mxu1 %v2015_v40 }
 0x18b   : > { %v1905_v34 = vunpack.i.l.bf16 %v1904_v27  ;;  %v1908_v56 = vunpack.i.h.bf16 %v1904_v27  ;;  %v2017_v15 = vunpack.i.l.bf16 %v2016_v31  ;;  %v2020_v51 = vunpack.i.h.bf16 %v2016_v31 }
 0x18d   : > { %861 = vmatprep.mubr.f32.mxu0 %v1905_v34  ;;  %1118 = vmatprep.mubr.f32.mxu1 %v1908_v56 }
 0x18e   : > { %v1909_v21 = vpop.trf.xlu0  ;;  %v2021_v18 = vpop.trf.xlu1  ;;  %862 = vmatmul.mubr.f32.gmra.mrb[2].mxu0 %v2017_v15  ;;  %1119 = vmatmul.mubr.f32.gmra.mrb[2].mxu1 %v2020_v51 }
 0x18f   : > { %v1910_v48 = vunpack.i.l.bf16 %v1909_v21  ;;  %v1913_v13 = vunpack.i.h.bf16 %v1909_v21  ;;  %v2022_v45 = vunpack.i.l.bf16 %v2021_v18  ;;  %v2025_v0 = vunpack.i.h.bf16 %v2021_v18 }
 0x191   : > { %866 = vmatprep.mubr.f32.mxu0 %v1910_v48  ;;  %1123 = vmatprep.mubr.f32.mxu1 %v1913_v13 }
 0x192   : > { %v1914_v2 = vpop.trf.xlu0  ;;  %v2026_v42 = vpop.trf.xlu1  ;;  %867 = vmatmul.mubr.f32.gmra.mrb[4].mxu0 %v2022_v45  ;;  %1124 = vmatmul.mubr.f32.gmra.mrb[4].mxu1 %v2025_v0 }
 0x193   : > { %v1915_v29 = vunpack.i.l.bf16 %v1914_v2  ;;  %v1918_v26 = vunpack.i.h.bf16 %v1914_v2  ;;  %v2027_v16 = vunpack.i.l.bf16 %v2026_v42  ;;  %v2030_v36 = vunpack.i.h.bf16 %v2026_v42 }
 0x195   : > { %871 = vmatprep.mubr.f32.mxu0 %v1915_v29  ;;  %1128 = vmatprep.mubr.f32.mxu1 %v1918_v26 }
 0x196   : > { %v1919_v53 = vpop.trf.xlu0  ;;  %v2031_v30 = vpop.trf.xlu1  ;;  %872 = vmatmul.mubr.f32.gmra.mrb[6].mxu0 %v2027_v16  ;;  %1129 = vmatmul.mubr.f32.gmra.mrb[6].mxu1 %v2030_v36 }
 0x197   : > { %v1920_v54 = vunpack.i.l.bf16 %v1919_v53  ;;  %v1923_v59 = vunpack.i.h.bf16 %v1919_v53  ;;  %v2032_v49 = vunpack.i.l.bf16 %v2031_v30  ;;  %v2035_v62 = vunpack.i.h.bf16 %v2031_v30 }
 0x199   : > { %876 = vmatprep.mubr.f32.mxu0 %v1920_v54  ;;  %1133 = vmatprep.mubr.f32.mxu1 %v1923_v59 }
 0x19a   : > { %v1924_v14 = vpop.trf.xlu0  ;;  %v2036_v57 = vpop.trf.xlu1  ;;  %877 = vmatmul.mubr.f32.gmra.mrb[8].mxu0 %v2032_v49  ;;  %1134 = vmatmul.mubr.f32.gmra.mrb[8].mxu1 %v2035_v62 }
 0x19b   : > { %v1925_v60 = vunpack.i.l.bf16 %v1924_v14  ;;  %v1928_v23 = vunpack.i.h.bf16 %v1924_v14  ;;  %v2037_v43 = vunpack.i.l.bf16 %v2036_v57  ;;  %v2040_v52 = vunpack.i.h.bf16 %v2036_v57 }
 0x19d   : > { %881 = vmatprep.mubr.f32.mxu0 %v1925_v60  ;;  %1138 = vmatprep.mubr.f32.mxu1 %v1928_v23 }
 0x19e   : > { %v1929_v58 = vpop.trf.xlu0  ;;  %v2041_v24 = vpop.trf.xlu1  ;;  %882 = vmatmul.mubr.f32.gmra.mrb[10].mxu0 %v2037_v43  ;;  %1139 = vmatmul.mubr.f32.gmra.mrb[10].mxu1 %v2040_v52  ;;  %v712_v43 = vld [vmem:[#allocation6] sm:$0xff] }
 0x19f   : > { %v1930_v12 = vunpack.i.l.bf16 %v1929_v58  ;;  %v1933_v32 = vunpack.i.h.bf16 %v1929_v58  ;;  %v2042_v63 = vunpack.i.l.bf16 %v2041_v24  ;;  %v2045_v55 = vunpack.i.h.bf16 %v2041_v24  ;;  %v969_v58 = vld [vmem:[#allocation7] sm:$0xff] }
 0x1a1   : > { %886 = vmatprep.mubr.f32.mxu0 %v1930_v12  ;;  %1143 = vmatprep.mubr.f32.mxu1 %v1933_v32 }
 0x1a2   : > { %v1934_v5 = vpop.trf.xlu0  ;;  %v2046_v10 = vpop.trf.xlu1  ;;  %887 = vmatmul.mubr.f32.gmra.mrb[12].mxu0 %v2042_v63  ;;  %1144 = vmatmul.mubr.f32.gmra.mrb[12].mxu1 %v2045_v55 }
 0x1a3   : > { %v1935_v20 = vunpack.i.l.bf16 %v1934_v5  ;;  %v1938_v7 = vunpack.i.h.bf16 %v1934_v5  ;;  %v2047_v9 = vunpack.i.l.bf16 %v2046_v10  ;;  %v2050_v6 = vunpack.i.h.bf16 %v2046_v10 }
 0x1a5   : > { %891 = vmatprep.mubr.f32.mxu0 %v1935_v20  ;;  %1148 = vmatprep.mubr.f32.mxu1 %v1938_v7  ;;  %v713_v20 = vld [vmem:[#allocation6 + $0x8] sm:$0xff] }
 0x1a6   : > { %v1939_v37 = vpop.trf.xlu0  ;;  %v2051_v8 = vpop.trf.xlu1  ;;  %892 = vmatmul.mubr.f32.gmra.mrb[14].mxu0 %v2047_v9  ;;  %1149 = vmatmul.mubr.f32.gmra.mrb[14].mxu1 %v2050_v6  ;;  %v970_v9 = vld [vmem:[#allocation7 + $0x8] sm:$0xff] }
 0x1a7   : > { %v1940_v41 = vunpack.i.l.bf16 %v1939_v37  ;;  %v1943_v38 = vunpack.i.h.bf16 %v1939_v37  ;;  %v2052_v28 = vunpack.i.l.bf16 %v2051_v8  ;;  %v2055_v3 = vunpack.i.h.bf16 %v2051_v8 }
 0x1a9   : > { %896 = vmatprep.mubr.f32.mxu0 %v1940_v41  ;;  %1153 = vmatprep.mubr.f32.mxu1 %v1943_v38 }
 0x1aa   : > { %v1944_v47 = vpop.trf.xlu0  ;;  %v2056_v39 = vpop.trf.xlu1  ;;  %897 = vmatmul.mubr.f32.gmra.mrb[16].mxu0 %v2052_v28  ;;  %1154 = vmatmul.mubr.f32.gmra.mrb[16].mxu1 %v2055_v3 }
 0x1ab   : > { %v1945_v35 = vunpack.i.l.bf16 %v1944_v47  ;;  %v1948_v50 = vunpack.i.h.bf16 %v1944_v47  ;;  %v2057_v4 = vunpack.i.l.bf16 %v2056_v39  ;;  %v2060_v22 = vunpack.i.h.bf16 %v2056_v39  ;;  %v714_v47 = vld [vmem:[#allocation6 + $0x10] sm:$0xff] }
 0x1ad   : > { %901 = vmatprep.mubr.f32.mxu0 %v1945_v35  ;;  %1158 = vmatprep.mubr.f32.mxu1 %v1948_v50  ;;  %v971_v35 = vld [vmem:[#allocation7 + $0x10] sm:$0xff] }
 0x1ae   : > { %v1949_v11 = vpop.trf.xlu0  ;;  %v2061_v61 = vpop.trf.xlu1  ;;  %902 = vmatmul.mubr.f32.gmra.mrb[18].mxu0 %v2057_v4  ;;  %1159 = vmatmul.mubr.f32.gmra.mrb[18].mxu1 %v2060_v22 }
 0x1af   : > { %v1950_v44 = vunpack.i.l.bf16 %v1949_v11  ;;  %v1953_v1 = vunpack.i.h.bf16 %v1949_v11  ;;  %v2062_v25 = vunpack.i.l.bf16 %v2061_v61  ;;  %v2065_v17 = vunpack.i.h.bf16 %v2061_v61 }
 0x1b1   : > { %906 = vmatprep.mubr.f32.mxu0 %v1950_v44  ;;  %1163 = vmatprep.mubr.f32.mxu1 %v1953_v1 }
 0x1b2   : > { %v1954_v33 = vpop.trf.xlu0  ;;  %v2066_v46 = vpop.trf.xlu1  ;;  %907 = vmatmul.mubr.f32.gmra.mrb[20].mxu0 %v2062_v25  ;;  %1164 = vmatmul.mubr.f32.gmra.mrb[20].mxu1 %v2065_v17  ;;  %v715_v25 = vld [vmem:[#allocation6 + $0x18] sm:$0xff] }
 0x1b3   : > { %v1955_v19 = vunpack.i.l.bf16 %v1954_v33  ;;  %v1958_v40 = vunpack.i.h.bf16 %v1954_v33  ;;  %v2067_v27 = vunpack.i.l.bf16 %v2066_v46  ;;  %v2070_v31 = vunpack.i.h.bf16 %v2066_v46  ;;  %v972_v33 = vld [vmem:[#allocation7 + $0x18] sm:$0xff] }
 0x1b5   : > { %911 = vmatprep.mubr.f32.mxu0 %v1955_v19  ;;  %1168 = vmatprep.mubr.f32.mxu1 %v1958_v40 }
 0x1b6   : > { %v1959_v34 = vpop.trf.xlu0  ;;  %v2071_v56 = vpop.trf.xlu1  ;;  %912 = vmatmul.mubr.f32.gmra.mrb[22].mxu0 %v2067_v27  ;;  %1169 = vmatmul.mubr.f32.gmra.mrb[22].mxu1 %v2070_v31 }
 0x1b7   : > { %v1960_v15 = vunpack.i.l.bf16 %v1959_v34  ;;  %v1963_v51 = vunpack.i.h.bf16 %v1959_v34  ;;  %v2072_v21 = vunpack.i.l.bf16 %v2071_v56  ;;  %v2075_v18 = vunpack.i.h.bf16 %v2071_v56 }
 0x1b9   : > { %916 = vmatprep.mubr.f32.mxu0 %v1960_v15  ;;  %1173 = vmatprep.mubr.f32.mxu1 %v1963_v51  ;;  %v716_v15 = vld [vmem:[#allocation6 + $0x20] sm:$0xff] }
 0x1ba   : > { %v1964_v48 = vpop.trf.xlu0  ;;  %v2076_v13 = vpop.trf.xlu1  ;;  %917 = vmatmul.mubr.f32.gmra.mrb[24].mxu0 %v2072_v21  ;;  %1174 = vmatmul.mubr.f32.gmra.mrb[24].mxu1 %v2075_v18  ;;  %v973_v21 = vld [vmem:[#allocation7 + $0x20] sm:$0xff] }
 0x1bb   : > { %v1965_v45 = vunpack.i.l.bf16 %v1964_v48  ;;  %v1968_v0 = vunpack.i.h.bf16 %v1964_v48  ;;  %v2077_v2 = vunpack.i.l.bf16 %v2076_v13  ;;  %v2080_v42 = vunpack.i.h.bf16 %v2076_v13 }
 0x1bd   : > { %921 = vmatprep.mubr.f32.mxu0 %v1965_v45  ;;  %1178 = vmatprep.mubr.f32.mxu1 %v1968_v0 }
 0x1be   : > { %v1969_v29 = vpop.trf.xlu0  ;;  %v2081_v26 = vpop.trf.xlu1  ;;  %922 = vmatmul.mubr.f32.gmra.mrb[26].mxu0 %v2077_v2  ;;  %1179 = vmatmul.mubr.f32.gmra.mrb[26].mxu1 %v2080_v42 }
 0x1bf   : > { %v1970_v16 = vunpack.i.l.bf16 %v1969_v29  ;;  %v1973_v36 = vunpack.i.h.bf16 %v1969_v29  ;;  %v2082_v53 = vunpack.i.l.bf16 %v2081_v26  ;;  %v2085_v30 = vunpack.i.h.bf16 %v2081_v26  ;;  %v717_v29 = vld [vmem:[#allocation6 + $0x28] sm:$0xff] }
 0x1c1   : > { %926 = vmatprep.mubr.f32.mxu0 %v1970_v16  ;;  %1183 = vmatprep.mubr.f32.mxu1 %v1973_v36  ;;  %v974_v16 = vld [vmem:[#allocation7 + $0x28] sm:$0xff] }
 0x1c2   : > { %v1974_v54 = vpop.trf.xlu0  ;;  %v2086_v59 = vpop.trf.xlu1  ;;  %927 = vmatmul.mubr.f32.gmra.mrb[28].mxu0 %v2082_v53  ;;  %1184 = vmatmul.mubr.f32.gmra.mrb[28].mxu1 %v2085_v30 }
 0x1c3   : > { %v1978_v49 = vunpack.i.h.bf16 %v1974_v54  ;;  %v1975_v62 = vunpack.i.l.bf16 %v1974_v54  ;;  %v2090_v14 = vunpack.i.h.bf16 %v2086_v59  ;;  %v2087_v57 = vunpack.i.l.bf16 %v2086_v59 }
 0x1c5   : > { %931 = vmatprep.mubr.f32.mxu0 %v1975_v62  ;;  %1188 = vmatprep.mubr.f32.mxu1 %v1978_v49 }
 0x1c6   : > { %932 = vmatmul.mubr.f32.gmra.mrb[30].mxu0 %v2087_v57  ;;  %1189 = vmatmul.mubr.f32.gmra.mrb[30].mxu1 %v2090_v14  ;;  %v718_v14 = vld [vmem:[#allocation6 + $0x30] sm:$0xff] }
 0x25d   : > { %v1583_v60 = vpop.f32.mrb[0].mxu0  ;;  %v1663_v23 = vpop.f32.mrb[0].mxu1 }
 0x25e   : > { %v1584_v52 = vpop.f32.mrb[1].mxu0  ;;  %v1664_v24 = vpop.f32.mrb[1].mxu1 }
 0x25f   : > { %v1585_v12 = vadd.f32 %v1584_v52, %v1583_v60  ;;  %v1665_v32 = vadd.f32 %v1664_v24, %v1663_v23  ;;  %v975_v60 = vld [vmem:[#allocation7 + $0x30] sm:$0xff] }
 0x261   : > { %v937_v63 = vadd.f32 %v1585_v12, %v712_v43  ;;  %v1194_v55 = vadd.f32 %v1665_v32, %v969_v58  ;;  %v1586_v5 = vpop.f32.mrb[2].mxu0  ;;  %v1666_v10 = vpop.f32.mrb[2].mxu1 }
 0x262   : > { %v1587_v7 = vpop.f32.mrb[3].mxu0  ;;  %v1667_v6 = vpop.f32.mrb[3].mxu1 }
 0x263   : > { %953 = vst [vmem:[#allocation6] sm:$0xff] %v937_v63  ;;  %1210 = vst [vmem:[#allocation7] sm:$0xff] %v1194_v55  ;;  %v1588_v37 = vadd.f32 %v1587_v7, %v1586_v5  ;;  %v1668_v8 = vadd.f32 %v1667_v6, %v1666_v10  ;;  %v719_v63 = vld [vmem:[#allocation6 + $0x38] sm:$0xff] }
 0x264   : > { %v976_v5 = vld [vmem:[#allocation7 + $0x38] sm:$0xff] }
 0x265   : > { %v938_v41 = vadd.f32 %v1588_v37, %v713_v20  ;;  %v1195_v38 = vadd.f32 %v1668_v8, %v970_v9  ;;  %v1589_v28 = vpop.f32.mrb[4].mxu0  ;;  %v1669_v3 = vpop.f32.mrb[4].mxu1 }
 0x266   : > { %v1590_v39 = vpop.f32.mrb[5].mxu0  ;;  %v1670_v50 = vpop.f32.mrb[5].mxu1 }
 0x267   : > { %954 = vst [vmem:[#allocation6 + $0x8] sm:$0xff] %v938_v41  ;;  %1211 = vst [vmem:[#allocation7 + $0x8] sm:$0xff] %v1195_v38  ;;  %v1591_v4 = vadd.f32 %v1590_v39, %v1589_v28  ;;  %v1671_v22 = vadd.f32 %v1670_v50, %v1669_v3  ;;  %v720_v41 = vld [vmem:[#allocation6 + $0x40] sm:$0xff] }
 0x268   : > { %v977_v28 = vld [vmem:[#allocation7 + $0x40] sm:$0xff] }
 0x269   : > { %v939_v11 = vadd.f32 %v1591_v4, %v714_v47  ;;  %v1196_v61 = vadd.f32 %v1671_v22, %v971_v35  ;;  %v1592_v44 = vpop.f32.mrb[6].mxu0  ;;  %v1672_v1 = vpop.f32.mrb[6].mxu1 }
 0x26a   : > { %v1593_v17 = vpop.f32.mrb[7].mxu0  ;;  %v1673_v46 = vpop.f32.mrb[7].mxu1 }
 0x26b   : > { %955 = vst [vmem:[#allocation6 + $0x10] sm:$0xff] %v939_v11  ;;  %1212 = vst [vmem:[#allocation7 + $0x10] sm:$0xff] %v1196_v61  ;;  %v1594_v19 = vadd.f32 %v1593_v17, %v1592_v44  ;;  %v1674_v40 = vadd.f32 %v1673_v46, %v1672_v1  ;;  %v721_v11 = vld [vmem:[#allocation6 + $0x48] sm:$0xff] }
 0x26c   : > { %v978_v44 = vld [vmem:[#allocation7 + $0x48] sm:$0xff] }
 0x26d   : > { %v940_v27 = vadd.f32 %v1594_v19, %v715_v25  ;;  %v1197_v31 = vadd.f32 %v1674_v40, %v972_v33  ;;  %v1595_v34 = vpop.f32.mrb[8].mxu0  ;;  %v1675_v56 = vpop.f32.mrb[8].mxu1 }
 0x26e   : > { %v1596_v51 = vpop.f32.mrb[9].mxu0  ;;  %v1676_v18 = vpop.f32.mrb[9].mxu1 }
 0x26f   : > { %956 = vst [vmem:[#allocation6 + $0x18] sm:$0xff] %v940_v27  ;;  %1213 = vst [vmem:[#allocation7 + $0x18] sm:$0xff] %v1197_v31  ;;  %v1597_v48 = vadd.f32 %v1596_v51, %v1595_v34  ;;  %v1677_v13 = vadd.f32 %v1676_v18, %v1675_v56  ;;  %v722_v27 = vld [vmem:[#allocation6 + $0x50] sm:$0xff] }
 0x270   : > { %v979_v34 = vld [vmem:[#allocation7 + $0x50] sm:$0xff] }
 0x271   : > { %v941_v45 = vadd.f32 %v1597_v48, %v716_v15  ;;  %v1198_v0 = vadd.f32 %v1677_v13, %v973_v21  ;;  %v1598_v2 = vpop.f32.mrb[10].mxu0  ;;  %v1678_v42 = vpop.f32.mrb[10].mxu1 }
 0x272   : > { %v1599_v26 = vpop.f32.mrb[11].mxu0  ;;  %v1679_v36 = vpop.f32.mrb[11].mxu1 }
 0x273   : > { %957 = vst [vmem:[#allocation6 + $0x20] sm:$0xff] %v941_v45  ;;  %1214 = vst [vmem:[#allocation7 + $0x20] sm:$0xff] %v1198_v0  ;;  %v1600_v53 = vadd.f32 %v1599_v26, %v1598_v2  ;;  %v1680_v30 = vadd.f32 %v1679_v36, %v1678_v42  ;;  %v723_v45 = vld [vmem:[#allocation6 + $0x58] sm:$0xff] }
 0x274   : > { %v980_v2 = vld [vmem:[#allocation7 + $0x58] sm:$0xff] }
 0x275   : > { %v942_v54 = vadd.f32 %v1600_v53, %v717_v29  ;;  %v1199_v59 = vadd.f32 %v1680_v30, %v974_v16  ;;  %v1601_v49 = vpop.f32.mrb[12].mxu0  ;;  %v1681_v62 = vpop.f32.mrb[12].mxu1 }
 0x276   : > { %v1602_v57 = vpop.f32.mrb[13].mxu0  ;;  %v1682_v23 = vpop.f32.mrb[13].mxu1 }
 0x277   : > { %958 = vst [vmem:[#allocation6 + $0x28] sm:$0xff] %v942_v54  ;;  %1215 = vst [vmem:[#allocation7 + $0x28] sm:$0xff] %v1199_v59  ;;  %v1603_v43 = vadd.f32 %v1602_v57, %v1601_v49  ;;  %v1683_v52 = vadd.f32 %v1682_v23, %v1681_v62  ;;  %v724_v54 = vld [vmem:[#allocation6 + $0x60] sm:$0xff] }
 0x278   : > { %v981_v49 = vld [vmem:[#allocation7 + $0x60] sm:$0xff] }
 0x279   : > { %v943_v58 = vadd.f32 %v1603_v43, %v718_v14  ;;  %v1200_v24 = vadd.f32 %v1683_v52, %v975_v60  ;;  %v1604_v12 = vpop.f32.mrb[14].mxu0  ;;  %v1684_v32 = vpop.f32.mrb[14].mxu1 }
 0x27a   : > { %v1605_v55 = vpop.f32.mrb[15].mxu0  ;;  %v1685_v10 = vpop.f32.mrb[15].mxu1 }
 0x27b   : > { %959 = vst [vmem:[#allocation6 + $0x30] sm:$0xff] %v943_v58  ;;  %1216 = vst [vmem:[#allocation7 + $0x30] sm:$0xff] %v1200_v24  ;;  %v1606_v20 = vadd.f32 %v1605_v55, %v1604_v12  ;;  %v1686_v7 = vadd.f32 %v1685_v10, %v1684_v32  ;;  %v725_v58 = vld [vmem:[#allocation6 + $0x68] sm:$0xff] }
 0x27c   : > { %v982_v12 = vld [vmem:[#allocation7 + $0x68] sm:$0xff] }
 0x27d   : > { %v944_v9 = vadd.f32 %v1606_v20, %v719_v63  ;;  %v1201_v6 = vadd.f32 %v1686_v7, %v976_v5  ;;  %v1607_v37 = vpop.f32.mrb[16].mxu0  ;;  %v1687_v8 = vpop.f32.mrb[16].mxu1 }
 0x27e   : > { %v1608_v38 = vpop.f32.mrb[17].mxu0  ;;  %v1688_v3 = vpop.f32.mrb[17].mxu1 }
 0x27f   : > { %960 = vst [vmem:[#allocation6 + $0x38] sm:$0xff] %v944_v9  ;;  %1217 = vst [vmem:[#allocation7 + $0x38] sm:$0xff] %v1201_v6  ;;  %v1609_v47 = vadd.f32 %v1608_v38, %v1607_v37  ;;  %v1689_v39 = vadd.f32 %v1688_v3, %v1687_v8  ;;  %v726_v9 = vld [vmem:[#allocation6 + $0x70] sm:$0xff] }
 0x280   : > { %v983_v37 = vld [vmem:[#allocation7 + $0x70] sm:$0xff] }
 0x281   : > { %v945_v35 = vadd.f32 %v1609_v47, %v720_v41  ;;  %v1202_v50 = vadd.f32 %v1689_v39, %v977_v28  ;;  %v1610_v4 = vpop.f32.mrb[18].mxu0  ;;  %v1690_v22 = vpop.f32.mrb[18].mxu1 }
 0x282   : > { %v1611_v61 = vpop.f32.mrb[19].mxu0  ;;  %v1691_v1 = vpop.f32.mrb[19].mxu1 }
 0x283   : > { %961 = vst [vmem:[#allocation6 + $0x40] sm:$0xff] %v945_v35  ;;  %1218 = vst [vmem:[#allocation7 + $0x40] sm:$0xff] %v1202_v50  ;;  %v1612_v25 = vadd.f32 %v1611_v61, %v1610_v4  ;;  %v1692_v17 = vadd.f32 %v1691_v1, %v1690_v22  ;;  %v727_v35 = vld [vmem:[#allocation6 + $0x78] sm:$0xff] }
 0x284   : > { %v984_v4 = vld [vmem:[#allocation7 + $0x78] sm:$0xff] }
 0x285   : > { %v946_v33 = vadd.f32 %v1612_v25, %v721_v11  ;;  %v1203_v46 = vadd.f32 %v1692_v17, %v978_v44  ;;  %v1613_v19 = vpop.f32.mrb[20].mxu0  ;;  %v1693_v40 = vpop.f32.mrb[20].mxu1 }
 0x286   : > { %v1614_v31 = vpop.f32.mrb[21].mxu0  ;;  %v1694_v56 = vpop.f32.mrb[21].mxu1 }
 0x287   : > { %962 = vst [vmem:[#allocation6 + $0x48] sm:$0xff] %v946_v33  ;;  %1219 = vst [vmem:[#allocation7 + $0x48] sm:$0xff] %v1203_v46  ;;  %v1615_v15 = vadd.f32 %v1614_v31, %v1613_v19  ;;  %v1695_v51 = vadd.f32 %v1694_v56, %v1693_v40 }
 0x289   : > { %v947_v21 = vadd.f32 %v1615_v15, %v722_v27  ;;  %v1204_v18 = vadd.f32 %v1695_v51, %v979_v34  ;;  %v1616_v48 = vpop.f32.mrb[22].mxu0  ;;  %v1696_v13 = vpop.f32.mrb[22].mxu1 }
 0x28a   : > { %v1617_v0 = vpop.f32.mrb[23].mxu0  ;;  %v1697_v42 = vpop.f32.mrb[23].mxu1 }
 0x28b   : > { %963 = vst [vmem:[#allocation6 + $0x50] sm:$0xff] %v947_v21  ;;  %1220 = vst [vmem:[#allocation7 + $0x50] sm:$0xff] %v1204_v18  ;;  %v1618_v29 = vadd.f32 %v1617_v0, %v1616_v48  ;;  %v1698_v26 = vadd.f32 %v1697_v42, %v1696_v13 }
 0x28d   : > { %v948_v16 = vadd.f32 %v1618_v29, %v723_v45  ;;  %v1205_v36 = vadd.f32 %v1698_v26, %v980_v2  ;;  %v1619_v53 = vpop.f32.mrb[24].mxu0  ;;  %v1699_v30 = vpop.f32.mrb[24].mxu1 }
 0x28e   : > { %v1620_v59 = vpop.f32.mrb[25].mxu0  ;;  %v1700_v62 = vpop.f32.mrb[25].mxu1 }
 0x28f   : > { %964 = vst [vmem:[#allocation6 + $0x58] sm:$0xff] %v948_v16  ;;  %1221 = vst [vmem:[#allocation7 + $0x58] sm:$0xff] %v1205_v36  ;;  %v1621_v14 = vadd.f32 %v1620_v59, %v1619_v53  ;;  %v1701_v57 = vadd.f32 %v1700_v62, %v1699_v30 }
 0x291   : > { %v949_v60 = vadd.f32 %v1621_v14, %v724_v54  ;;  %v1206_v23 = vadd.f32 %v1701_v57, %v981_v49  ;;  %v1622_v43 = vpop.f32.mrb[26].mxu0  ;;  %v1702_v52 = vpop.f32.mrb[26].mxu1 }
 0x292   : > { %v1623_v24 = vpop.f32.mrb[27].mxu0  ;;  %v1703_v32 = vpop.f32.mrb[27].mxu1 }
 0x293   : > { %965 = vst [vmem:[#allocation6 + $0x60] sm:$0xff] %v949_v60  ;;  %1222 = vst [vmem:[#allocation7 + $0x60] sm:$0xff] %v1206_v23  ;;  %v1624_v63 = vadd.f32 %v1623_v24, %v1622_v43  ;;  %v1704_v55 = vadd.f32 %v1703_v32, %v1702_v52 }
 0x295   : > { %v950_v5 = vadd.f32 %v1624_v63, %v725_v58  ;;  %v1207_v10 = vadd.f32 %v1704_v55, %v982_v12  ;;  %v1625_v20 = vpop.f32.mrb[28].mxu0  ;;  %v1705_v7 = vpop.f32.mrb[28].mxu1 }
 0x296   : > { %v1626_v6 = vpop.f32.mrb[29].mxu0  ;;  %v1706_v8 = vpop.f32.mrb[29].mxu1 }
 0x297   : > { %966 = vst [vmem:[#allocation6 + $0x68] sm:$0xff] %v950_v5  ;;  %1223 = vst [vmem:[#allocation7 + $0x68] sm:$0xff] %v1207_v10  ;;  %v1627_v41 = vadd.f32 %v1626_v6, %v1625_v20  ;;  %v1707_v38 = vadd.f32 %v1706_v8, %v1705_v7 }
 0x299   : > { %v951_v28 = vadd.f32 %v1627_v41, %v726_v9  ;;  %v1208_v3 = vadd.f32 %v1707_v38, %v983_v37  ;;  %v1628_v47 = vpop.f32.mrb[30].mxu0  ;;  %v1708_v39 = vpop.f32.mrb[30].mxu1 }
 0x29a   : > { %v1629_v50 = vpop.f32.mrb[31].mxu0  ;;  %v1709_v22 = vpop.f32.mrb[31].mxu1 }
 0x29b   : > { %967 = vst [vmem:[#allocation6 + $0x70] sm:$0xff] %v951_v28  ;;  %1224 = vst [vmem:[#allocation7 + $0x70] sm:$0xff] %v1208_v3  ;;  %v1630_v11 = vadd.f32 %v1629_v50, %v1628_v47  ;;  %v1710_v61 = vadd.f32 %v1709_v22, %v1708_v39 }
 0x29d   : > { %v952_v44 = vadd.f32 %v1630_v11, %v727_v35  ;;  %v1209_v1 = vadd.f32 %v1710_v61, %v984_v4 }
 0x29f   : > { %968 = vst [vmem:[#allocation6 + $0x78] sm:$0xff] %v952_v44  ;;  %1225 = vst [vmem:[#allocation7 + $0x78] sm:$0xff] %v1209_v1 }
 0x2a0 PF: > { %p1298_p0 = scmp.eq.s32.totalorder %s2225_s12, 1 }
 0x2a2   : > { %p1299_p4 = pnand %p1298_p0, %p538_p2 }
 0x2a3   : > { %v1303_v25 = vld [vmem:[#allocation6] sm:$0xff] (!%p1299_p4)  ;;  %v1304_v17 = vld [vmem:[#allocation6 + $0x8] sm:$0xff] (!%p1299_p4)  ;;  %v1305_v33 = vld [vmem:[#allocation6 + $0x10] sm:$0xff] (!%p1299_p4)  ;;  %vm1420_vm0 = vcmask (!%p1299_p4), 1040384  }
 0x2a4   : > { %1302 = sbr.rel (%p1299_p4) target bundleno = 927 (0x39f), region = 52  ;;  %v1306_v46 = vld [vmem:[#allocation6 + $0x18] sm:$0xff] (!%p1299_p4)  ;;  %v1335_v19 = vmul.f32 (!%p1299_p4), %v1303_v25, %v1303_v25  ;;  %v1336_v40 = vmul.f32 (!%p1299_p4), %v1304_v17, %v1304_v17  ;;  %v1337_v27 = vmul.f32 (!%p1299_p4), %v1305_v33, %v1305_v33  ;;  %v1307_v31 = vld [vmem:[#allocation6 + $0x20] sm:$0xff] (!%p1299_p4)  ;;  %v1308_v15 = vld [vmem:[#allocation6 + $0x28] sm:$0xff] (!%p1299_p4) }
 0x2a5   : > { %v1338_v34 = vmul.f32 (!%p1299_p4), %v1306_v46, %v1306_v46  ;;  %v1339_v51 = vmul.f32 (!%p1299_p4), %v1307_v31, %v1307_v31  ;;  %v1419_v18 = vld [vmem:[#allocation8] sm:$0x1] (!%p1299_p4)  ;;  %v1309_v13 = vld [vmem:[#allocation6 + $0x30] sm:$0xff] (!%p1299_p4)  ;;  %v1320_v0 = vld [vmem:[#allocation7 + $0x8] sm:$0xff] (!%p1299_p4)  ;;  %v1340_v29 = vmul.f32 (!%p1299_p4), %v1308_v15, %v1308_v15 }
 0x2a6   : > { %v1351_v56 = vadd.f32 (!%p1299_p4), %v1336_v40, %v1335_v19  ;;  %v1319_v48 = vld [vmem:[#allocation7] sm:$0xff] (!%p1299_p4)  ;;  %v1421_v45 = vsel (!%p1299_p4), %vm1420_vm0, %v1419_v18, 0.0  ;;  %v1321_v2 = vld [vmem:[#allocation7 + $0x10] sm:$0xff] (!%p1299_p4)  ;;  %v1322_v16 = vld [vmem:[#allocation7 + $0x18] sm:$0xff] (!%p1299_p4)  ;;  %v1378_v36 = vmul.f32 (!%p1299_p4), %v1320_v0, %v1320_v0  ;;  %v1341_v54 = vmul.f32 (!%p1299_p4), %v1309_v13, %v1309_v13 }
 0x2a7   : > { %v1377_v42 = vmul.f32 (!%p1299_p4), %v1319_v48, %v1319_v48  ;;  %1422 = vadd.xlane.f32.xlu1 (!%p1299_p4), %v1421_v45  ;;  %v1310_v53 = vld [vmem:[#allocation6 + $0x38] sm:$0xff] (!%p1299_p4)  ;;  %v1379_v30 = vmul.f32 (!%p1299_p4), %v1321_v2, %v1321_v2  ;;  %v1323_v49 = vld [vmem:[#allocation7 + $0x20] sm:$0xff] (!%p1299_p4)  ;;  %v1380_v14 = vmul.f32 (!%p1299_p4), %v1322_v16, %v1322_v16  ;;  %v1324_v43 = vld [vmem:[#allocation7 + $0x28] sm:$0xff] (!%p1299_p4) }
 0x2a8   : > { %v1352_v21 = vadd.f32 (!%p1299_p4), %v1351_v56, %v1337_v27  ;;  %v1311_v62 = vld [vmem:[#allocation6 + $0x40] sm:$0xff] (!%p1299_p4)  ;;  %v1342_v60 = vmul.f32 (!%p1299_p4), %v1310_v53, %v1310_v53  ;;  %v1312_v52 = vld [vmem:[#allocation6 + $0x48] sm:$0xff] (!%p1299_p4)  ;;  %v1381_v58 = vmul.f32 (!%p1299_p4), %v1323_v49, %v1323_v49  ;;  %v1325_v63 = vld [vmem:[#allocation7 + $0x30] sm:$0xff] (!%p1299_p4)  ;;  %v1382_v5 = vmul.f32 (!%p1299_p4), %v1324_v43, %v1324_v43 }
 0x2a9   : > { %v1393_v57 = vadd.f32 (!%p1299_p4), %v1378_v36, %v1377_v42  ;;  %v1343_v12 = vmul.f32 (!%p1299_p4), %v1311_v62, %v1311_v62  ;;  %v1313_v55 = vld [vmem:[#allocation6 + $0x50] sm:$0xff] (!%p1299_p4)  ;;  %v1344_v20 = vmul.f32 (!%p1299_p4), %v1312_v52, %v1312_v52  ;;  %v1326_v9 = vld [vmem:[#allocation7 + $0x38] sm:$0xff] (!%p1299_p4)  ;;  %v1383_v37 = vmul.f32 (!%p1299_p4), %v1325_v63, %v1325_v63  ;;  %v1327_v28 = vld [vmem:[#allocation7 + $0x40] sm:$0xff] (!%p1299_p4) }
 0x2aa   : > { %v1353_v26 = vadd.f32 (!%p1299_p4), %v1352_v21, %v1338_v34  ;;  %v1314_v6 = vld [vmem:[#allocation6 + $0x58] sm:$0xff] (!%p1299_p4)  ;;  %v1345_v41 = vmul.f32 (!%p1299_p4), %v1313_v55, %v1313_v55  ;;  %v1315_v3 = vld [vmem:[#allocation6 + $0x60] sm:$0xff] (!%p1299_p4)  ;;  %v1384_v47 = vmul.f32 (!%p1299_p4), %v1326_v9, %v1326_v9  ;;  %v1328_v4 = vld [vmem:[#allocation7 + $0x48] sm:$0xff] (!%p1299_p4)  ;;  %v1385_v11 = vmul.f32 (!%p1299_p4), %v1327_v28, %v1327_v28 }
 0x2ab   : > { %v1394_v24 = vadd.f32 %v1393_v57, %v1379_v30  ;;  %v1346_v35 = vmul.f32 %v1314_v6, %v1314_v6  ;;  %v1316_v22 = vld [vmem:[#allocation6 + $0x68] sm:$0xff]  ;;  %v1347_v44 = vmul.f32 %v1315_v3, %v1315_v3  ;;  %v1329_v25 = vld [vmem:[#allocation7 + $0x50] sm:$0xff]  ;;  %v1386_v33 = vmul.f32 %v1328_v4, %v1328_v4  ;;  %v1330_v27 = vld [vmem:[#allocation7 + $0x58] sm:$0xff] }
 0x2ac   : > { %v1354_v59 = vadd.f32 %v1353_v26, %v1339_v51  ;;  %v1317_v17 = vld [vmem:[#allocation6 + $0x70] sm:$0xff]  ;;  %v1348_v19 = vmul.f32 %v1316_v22, %v1316_v22  ;;  %v1318_v31 = vld [vmem:[#allocation6 + $0x78] sm:$0xff]  ;;  %v1387_v34 = vmul.f32 %v1329_v25, %v1329_v25  ;;  %v1331_v21 = vld [vmem:[#allocation7 + $0x60] sm:$0xff]  ;;  %v1388_v18 = vmul.f32 %v1330_v27, %v1330_v27 }
 0x2ad   : > { %v1395_v10 = vadd.f32 %v1394_v24, %v1380_v14  ;;  %v1349_v15 = vmul.f32 %v1317_v17, %v1317_v17  ;;  %v1350_v13 = vmul.f32 %v1318_v31, %v1318_v31  ;;  %v1332_v0 = vld [vmem:[#allocation7 + $0x68] sm:$0xff]  ;;  %v1389_v2 = vmul.f32 %v1331_v21, %v1331_v21  ;;  %v1333_v26 = vld [vmem:[#allocation7 + $0x70] sm:$0xff]  ;;  %v1334_v30 = vld [vmem:[#allocation7 + $0x78] sm:$0xff] }
 0x2ae   : > { %v1355_v23 = vadd.f32 %v1354_v59, %v1340_v29  ;;  %v1390_v16 = vmul.f32 %v1332_v0, %v1332_v0  ;;  %v1392_v49 = vmul.f32 %v1334_v30, %v1334_v30 }
 0x2af   : > { %v1396_v8 = vadd.f32 %v1395_v10, %v1381_v58 }
 0x2b0   : > { %v1356_v32 = vadd.f32 %v1355_v23, %v1341_v54  ;;  %v1391_v54 = vmul.f32 %v1333_v26, %v1333_v26 }
 0x2b1   : > { %v1397_v39 = vadd.f32 %v1396_v8, %v1382_v5 }
 0x2b2   : > { %v1357_v7 = vadd.f32 %v1356_v32, %v1342_v60 }
 0x2b3   : > { %v1398_v61 = vadd.f32 %v1397_v39, %v1383_v37 }
 0x2b4   : > { %v1358_v38 = vadd.f32 %v1357_v7, %v1343_v12 }
 0x2b5   : > { %v1399_v46 = vadd.f32 %v1398_v61, %v1384_v47 }
 0x2b6   : > { %v1359_v50 = vadd.f32 %v1358_v38, %v1344_v20 }
 0x2b7   : > { %v1400_v56 = vadd.f32 %v1399_v46, %v1385_v11 }
 0x2b8   : > { %v1360_v1 = vadd.f32 %v1359_v50, %v1345_v41 }
 0x2b9   : > { %v1401_v48 = vadd.f32 %v1400_v56, %v1386_v33 }
 0x2ba   : > { %v1361_v40 = vadd.f32 %v1360_v1, %v1346_v35 }
 0x2bb   : > { %v1402_v42 = vadd.f32 %v1401_v48, %v1387_v34 }
 0x2bc   : > { %v1362_v51 = vadd.f32 %v1361_v40, %v1347_v44 }
 0x2bd   : > { %v1403_v36 = vadd.f32 %v1402_v42, %v1388_v18 }
 0x2be   : > { %v1363_v45 = vadd.f32 %v1362_v51, %v1348_v19 }
 0x2bf   : > { %v1404_v59 = vadd.f32 %v1403_v36, %v1389_v2 }
 0x2c0   : > { %v1364_v29 = vadd.f32 %v1363_v45, %v1349_v15 }
 0x2c1   : > { %v1405_v62 = vadd.f32 %v1404_v59, %v1390_v16 }
 0x2c2   : > { %v1365_v53 = vadd.f32 %v1364_v29, %v1350_v13 }
 0x2c3   : > { %v1406_v14 = vadd.f32 %v1405_v62, %v1391_v54 }
 0x2c4   : > { %1366 = vadd.xlane.f32.xlu0 %v1365_v53 }
 0x2c5   : > { %v1407_v57 = vadd.f32 %v1406_v14, %v1392_v49 }
 0x2c8   : > { %1408 = vadd.xlane.f32.xlu0 %v1407_v57 }
 0x334   : > { %v1423_v60 = vpop.xlane.xlu1 %1422 }
 0x335   : > { %v1424_v23 = vrot.slane %v1423_v60, 4 }
 0x337   : > { %v1425_v24 = vadd.f32 %v1424_v23, %v1423_v60 }
 0x339   : > { %v1426_v32 = vrot.slane %v1425_v24, 2 }
 0x33b   : > { %v1427_v7 = vadd.f32 %v1426_v32, %v1425_v24 }
 0x33d   : > { %v1428_v8 = vrot.slane %v1427_v7, 1 }
 0x33f   : > { %v1429_v28 = vadd.f32 %v1428_v8, %v1427_v7 }
 0x351   : > { %v1367_v43 = vpop.xlane.xlu0 %1366 }
 0x352   : > { %v1368_v52 = vrot.slane %v1367_v43, 4 }
 0x354   : > { %v1369_v58 = vadd.f32 %v1368_v52, %v1367_v43 }
 0x355   : > { %v1409_v63 = vpop.xlane.xlu0 %1408 }
 0x356   : > { %v1370_v12 = vrot.slane %v1369_v58, 2  ;;  %v1410_v5 = vrot.slane %v1409_v63, 4 }
 0x358   : > { %v1371_v55 = vadd.f32 %v1370_v12, %v1369_v58  ;;  %v1411_v20 = vadd.f32 %v1410_v5, %v1409_v63 }
 0x35a   : > { %v1372_v10 = vrot.slane %v1371_v55, 1  ;;  %v1412_v6 = vrot.slane %v1411_v20, 2 }
 0x35c   : > { %v1373_v9 = vadd.f32 %v1372_v10, %v1371_v55  ;;  %v1413_v37 = vadd.f32 %v1412_v6, %v1411_v20 }
 0x35e   : > { %1775 = vpush %v1373_v9  ;;  %v1414_v41 = vrot.slane %v1413_v37, 1 }
 0x360   : > { %v1415_v38 = vadd.f32 %v1414_v41, %v1413_v37 }
 0x362   : > { %1777 = vpush %v1415_v38 }
 0x363   : > { %1779 = vpush %v1429_v28 }
 0x38f   : > { %s1776_s12 = spop %1775 }
 0x390   : > { %s1543_s13 = sadd.f32 -1022.0, %s1776_s12 }
 0x392   : > { %s1376_s20 = sadd.f32 128.0, %s1543_s13 }
 0x393   : > { %s1778_s25 = spop %1777 }
 0x394   : > { %s1544_s7 = sadd.f32 -1022.0, %s1778_s25  ;;  %s1780_s9 = spop %1779 }
 0x395   : > { %s1431_s3 = smul.f32 2.0, %s1780_s9 }
 0x396   : > { %s1418_s28 = sadd.f32 128.0, %s1544_s7 }
 0x397   : > { %s1432_s29 = ssub.f32 1022.0, %s1431_s3 }
 0x398   : > { %s1433_s30 = sadd.f32 %s1418_s28, %s1376_s20 }
 0x39a   : > { %s1434_s26 = smul.f32 0.001, %s1433_s30 }
 0x39c   : > { %s1435_s6 = sadd.f32 %s1434_s26, %s1432_s29 }
 0x39e   : > { %1437 = sst [smem:[#allocation14]] %s1435_s6 }
 0x39f PF: > { %p1797_p6 = scmp.eq.s32.totalorder %s1529_s17, 3  ;;  %s2155_s27 = scalar_lea.hbm %s3429_s2, 16 }
 0x3a0   : > { %p2156_p7 = scmp.ne.s32.totalorder %s3429_s2, %s2155_s27  ;;  %p2161_p1 = scmp.lt.u32.totalorder %s2155_s27, %s3429_s2 }
 0x3a2   : > { %p2157_p11 = pnand %p2156_p7, %p1797_p6 }
 0x3a4   : > { %p2158_p13 = pneg %p2157_p11 }
 0x3a6   : > { %p2163_p9 = pnand %p2161_p1, %p2158_p13 }
 0x3a8   : > { %2166 = shalt.err (!%p2163_p9)
}
 0x3a9   : > { %s2248_s12 = smov [#allocation14]  }
 0x3aa   : > { %1786 = dma.smem_to_hbm (%p1797_p6), %s2248_s12, 16, %s3429_s2, [#allocation11]  }
 0x3ab   : > { %2208 = dma.done.wait (%p1797_p6), [#allocation11], 16  }
 0x3ac   : > { %2210 = vsyncadd (%p1797_p6), [#allocation11], 4294967280 }
 0x3ad   : > { %1451 = sfence }
 0x3ae PF: > { %s19_s16 = sadd.s32 1, %s2241_s16   ;;  %s3608_s9 = smov %s2217_s10 }
 0x3af   : > { %p16_p10 = scmp.ge.s32.totalorder %s19_s16, 6   ;;  %s3609_s10 = smov %s2221_s11 }
 0x3b0   : > { %s3610_s11 = smov %s2322_s23  ;;  %s3611_s12 = smov %s2233_s14 }
 0x3b1   : > { %s3612_s13 = smov %s2237_s15  ;;  %s3613_s14 = smov %s3616_s18 }
 0x3b2   : > { %s3614_s15 = smov %s3620_s19  ;;  %18 = sbr.rel (!%p16_p10) target bundleno = 8 (0x8), region = 95 }
 0x3b9   :  { %1457 = vsyncpa [#allocation10], 1 }
 0x3ba   :  { %1459 = vsyncpa [#allocation10 + $0x1], 1 }
 0x3bb   :  { %1460 = vsyncpa [#allocation13], 1 }
 0x3bc   :  { %1462 = vsyncpa [#allocation13 + $0x1], 1 }
 0x3bd   :  { %1463 = vsyncpa [#allocation11], 1 }
 0x3be   :  { %1465 = vsyncpa [#allocation11 + $0x1], 1 }

</bundles_post_ra>
